<compile_context>
chip_gen: v6e
topology: v6e:2x2x1
jax: 0.10.0
libtpu: 0.0.40
codegen_flags: <defaults>
</compile_context>

<pallas_src>
import functools

import jax
import jax.numpy as jnp
from jax.experimental import pallas as pl
from jax.experimental.pallas import tpu as pltpu

LANE = 128


def _round_up(x, m):
    return ((x + m - 1) // m) * m


def _silu(z):
    # Numerically-stable z * sigmoid(z): one exp (EUP slot), no overflow branch.
    e = jnp.exp(-jnp.abs(z))
    s = 1.0 / (1.0 + e)
    return z * jnp.where(z >= 0, s, 1.0 - s)


def _make_lobe_kernel(tb, hp, h2p, num_layers):
    """Fused kernel. Ref order: d_flat, 12 equivariant params, 2*num_layers MLP
    params, out. All feature dims are already padded to multiples of 128."""
    npb = 3 * hp     # total width of the p (vec1_proj) blocks in the fused proj
    nqb = 3 * h2p    # total width of the q (vec2_proj) blocks

    def kernel(d_ref, wproj_ref, w1b_ref, b1_ref, w1o_ref, b1ox_ref, b1og_ref,
               w2v1_ref, w2a_ref, w2b_ref, b2_ref, w2ox_ref, b2ox_ref, *rest):
        mlp_refs = rest[:2 * num_layers]
        out_ref = rest[2 * num_layers]

        d = d_ref[...]                                        # (TB, 4H) = [x|v0|v1|v2]

        # ---- GatedEquivariantBlock 1 (H -> H//2, scalar_activation=True) ----
        # One MXU issue for vec1_proj(v0..v2), vec2_proj(v0..v2) and x@w1a:
        # Wproj is block-structured so every slice below is 128-lane aligned.
        proj = jnp.dot(d, wproj_ref[...], preferred_element_type=jnp.float32)
        p0 = proj[:, 0:hp]
        p1 = proj[:, hp:2 * hp]
        p2 = proj[:, 2 * hp:3 * hp]
        q0 = proj[:, npb:npb + h2p]
        q1 = proj[:, npb + h2p:npb + 2 * h2p]
        q2 = proj[:, npb + 2 * h2p:npb + 3 * h2p]
        xa = proj[:, npb + nqb:npb + nqb + hp]

        vec1 = jnp.sqrt(p0 * p0 + p1 * p1 + p2 * p2)          # ||vec1_proj(v)|| over dim=-2
        u = _silu(xa
                  + jnp.dot(vec1, w1b_ref[...], preferred_element_type=jnp.float32)
                  + b1_ref[...])
        # update_net second Linear: scalar-out and vector-gate columns fused (N-cat)
        o = jnp.dot(u, w1o_ref[...], preferred_element_type=jnp.float32)
        xs = _silu(o[:, :h2p] + b1ox_ref[...])
        gate = o[:, h2p:] + b1og_ref[...]

        # ---- GatedEquivariantBlock 2 (H//2 -> I, scalar_activation=False) ----
        # M-stack the three gated vector components -> one dot for vec1_proj.
        n_slab = jnp.concatenate([gate * q0, gate * q1, gate * q2], axis=0)   # (3TB, H2p)
        r = jnp.dot(n_slab, w2v1_ref[...], preferred_element_type=jnp.float32)
        r0 = r[0:tb]
        r1 = r[tb:2 * tb]
        r2 = r[2 * tb:3 * tb]
        vec1b = jnp.sqrt(r0 * r0 + r1 * r1 + r2 * r2)
        u2 = _silu(jnp.dot(xs, w2a_ref[...], preferred_element_type=jnp.float32)
                   + jnp.dot(vec1b, w2b_ref[...], preferred_element_type=jnp.float32)
                   + b2_ref[...])
        h = jnp.dot(u2, w2ox_ref[...], preferred_element_type=jnp.float32) + b2ox_ref[...]
        # final equivariant v output is multiplied by 0 in pre_reduce -> skipped

        # ---- output projection MLP (Linear + ReLU hidden, linear out) ----
        for i in range(num_layers):
            h = (jnp.dot(h, mlp_refs[2 * i][...], preferred_element_type=jnp.float32)
                 + mlp_refs[2 * i + 1][...])
            if i < num_layers - 1:
                h = jnp.maximum(h, 0.0)
        out_ref[...] = h.astype(out_ref.dtype)                # lane-dense (TB, Op) store

    return kernel


def lobe_forward(data, kernel_params, *, hidden_channels, output_channels,
                 num_layers, block_b=512):
    """data: (B, 4, H) float32.  kernel_params: list from prepare_kernel_params."""
    B, four, H = data.shape
    assert four == 4 and H == hidden_channels
    H2 = H // 2
    Hp = _round_up(H, LANE)
    H2p = _round_up(H2, LANE)
    Op = kernel_params[-2].shape[1]            # padded output width (last MLP weight)

    # (B,4,H) -> (B,4H) merges contiguous trailing dims: no data movement.
    d_flat = data.reshape(B, 4 * H)

    # Batch tile: large to amortize per-step pipeline overhead, multiple of 8,
    # capped so (2 input + 2 output buffers + intermediates) stay well inside
    # v7x's 64 MiB physical / 32 MiB scoped VMEM.
    TB = min(block_b, _round_up(B, 8))
    grid = (pl.cdiv(B, TB),)

    in_specs = [pl.BlockSpec((TB, 4 * H), lambda i: (i, 0))]
    # Constant block index -> weights/biases stay VMEM-resident across steps.
    in_specs += [pl.BlockSpec(p.shape, lambda i: (0, 0)) for p in kernel_params]
    out_specs = pl.BlockSpec((TB, Op), lambda i: (i, 0))

    # Advisory cost estimate so XLA can overlap neighbouring HLO with the call.
    param_bytes = sum(int(p.size) * p.dtype.itemsize for p in kernel_params)
    flops = 2 * B * sum(int(p.shape[0]) * int(p.shape[1])
                        for p in kernel_params if p.shape[0] > 1)
    cost = pl.CostEstimate(
        flops=int(flops),
        transcendentals=int(B * (Hp + 2 * H2p)),
        bytes_accessed=int(d_flat.size) * 4 + B * Op * 4 + param_bytes)

    out_padded = pl.pallas_call(
        _make_lobe_kernel(TB, Hp, H2p, num_layers),
        grid=grid,
        in_specs=in_specs,
        out_specs=out_specs,
        out_shape=jax.ShapeDtypeStruct((B, Op), jnp.float32),
        compiler_params=pltpu.CompilerParams(
            dimension_semantics=("parallel",),
            vmem_limit_bytes=32 * 1024 * 1024),
        cost_estimate=cost,
    )(d_flat, *kernel_params)
    return out_padded[:, :output_channels]


def init_params(key, hidden_channels, intermediate_channels, output_channels, num_layers):
    """Logical (unpadded) parameters, mirroring the PyTorch module layout."""
    H, I, O = hidden_channels, intermediate_channels, output_channels
    H2 = H // 2
    keys = iter(jax.random.split(key, 64))

    def w(shape, scale=0.1):
        return scale * jax.random.normal(next(keys), shape, dtype=jnp.float32)

    params = [
        # GatedEquivariantBlock 1
        w((H, H)),      # w1v1: vec1_proj (no bias)
        w((H, H2)),     # w1v2: vec2_proj (no bias)
        w((H, H)),      # w1a : update_net Linear(2H->H), rows acting on x
        w((H, H)),      # w1b : update_net Linear(2H->H), rows acting on vec1
        w((1, H)),      # b1
        w((H, H2)),     # w1ox: update_net Linear(H->2*H2), cols -> scalar out
        w((1, H2)),     # b1ox
        w((H, H2)),     # w1og: cols -> vector gate
        w((1, H2)),     # b1og
        # GatedEquivariantBlock 2
        w((H2, H2)),    # w2v1: vec1_proj
        w((H2, H2)),    # w2a : update_net Linear(H->H2), rows acting on x
        w((H2, H2)),    # w2b : rows acting on vec1
        w((1, H2)),     # b2
        w((H2, I)),     # w2ox: scalar-output columns of Linear(H2->2I)
        w((1, I)),      # b2ox
    ]
    # MLP: I -> I (ReLU) ... -> O
    for i in range(num_layers):
        d_in = I
        d_out = O if i == num_layers - 1 else I
        params.append(w((d_in, d_out)))
        params.append(w((1, d_out)))
    return params


def prepare_kernel_params(params, hidden_channels, intermediate_channels,
                          output_channels, num_layers):
    """One-time prep: zero-pad feature dims to 128 lanes and build the fused,
    block-structured projection weight used by the kernel."""
    H, I, O = hidden_channels, intermediate_channels, output_channels
    H2 = H // 2
    Hp, H2p, Ip, Op = (_round_up(H, LANE), _round_up(H2, LANE),
                       _round_up(I, LANE), _round_up(O, LANE))
    (w1v1, w1v2, w1a, w1b, b1, w1ox, b1ox, w1og, b1og,
     w2v1, w2a, w2b, b2, w2ox, b2ox) = params[:15]
    mlp = params[15:]

    def pad2(w_, r, c):
        out = jnp.zeros((r, c), jnp.float32)
        return out.at[:w_.shape[0], :w_.shape[1]].set(w_)

    # Fused projection weight: d_flat columns are [x (H) | v0 (H) | v1 (H) | v2 (H)];
    # output columns are [p0|p1|p2 (Hp each) | q0|q1|q2 (H2p each) | x@w1a (Hp)].
    Din = 4 * H
    Nproj = 3 * Hp + 3 * H2p + Hp
    Wproj = jnp.zeros((Din, Nproj), jnp.float32)
    for c in range(3):
        Wproj = Wproj.at[(c + 1) * H:(c + 2) * H, c * Hp:c * Hp + H].set(w1v1)
        Wproj = Wproj.at[(c + 1) * H:(c + 2) * H,
                         3 * Hp + c * H2p:3 * Hp + c * H2p + H2].set(w1v2)
    Wproj = Wproj.at[0:H, 3 * Hp + 3 * H2p:3 * Hp + 3 * H2p + H].set(w1a)

    # update_net second Linear of GEB1: scalar-out and gate columns N-concatenated.
    W1o = jnp.zeros((Hp, 2 * H2p), jnp.float32)
    W1o = W1o.at[:H, :H2].set(w1ox)
    W1o = W1o.at[:H, H2p:H2p + H2].set(w1og)

    kparams = [
        Wproj,
        pad2(w1b, Hp, Hp), pad2(b1, 1, Hp),
        W1o, pad2(b1ox, 1, H2p), pad2(b1og, 1, H2p),
        pad2(w2v1, H2p, H2p),
        pad2(w2a, H2p, H2p), pad2(w2b, H2p, H2p), pad2(b2, 1, H2p),
        pad2(w2ox, H2p, Ip), pad2(b2ox, 1, Ip),
    ]
    for i in range(num_layers):
        d_out_p = Op if i == num_layers - 1 else Ip
        kparams.append(pad2(mlp[2 * i], Ip, d_out_p))
        kparams.append(pad2(mlp[2 * i + 1], 1, d_out_p))
    return kparams


def lobe_reference(data, params, num_layers):
    """Pure-JAX reference of the same forward pass (for verification)."""
    (w1v1, w1v2, w1a, w1b, b1, w1ox, b1ox, w1og, b1og,
     w2v1, w2a, w2b, b2, w2ox, b2ox) = params[:15]
    mlp = params[15:]
    x = data[:, 0, :]
    v = data[:, 1:, :]                                  # (B, 3, H)
    silu = lambda z: z * jax.nn.sigmoid(z)

    vp = v @ w1v1
    vec1 = jnp.sqrt(jnp.sum(vp * vp, axis=1))
    vec2 = v @ w1v2
    u = silu(x @ w1a + vec1 @ w1b + b1)
    xs = silu(u @ w1ox + b1ox)
    gate = u @ w1og + b1og
    nv = gate[:, None, :] * vec2

    rp = nv @ w2v1
    vec1b = jnp.sqrt(jnp.sum(rp * rp, axis=1))
    u2 = silu(xs @ w2a + vec1b @ w2b + b2)
    h = u2 @ w2ox + b2ox

    for i in range(num_layers):
        h = h @ mlp[2 * i] + mlp[2 * i + 1]
        if i < num_layers - 1:
            h = jnp.maximum(h, 0.0)
    return h


if __name__ == "__main__":
    batch = 8
    hidden_channels = 32
    intermediate_channels = 32
    output_channels = 16
    num_layers = 3

    key = jax.random.PRNGKey(0)
    k_data, k_par = jax.random.split(key)
    data = jax.random.normal(k_data, (batch, 4, hidden_channels), dtype=jnp.float32)
    params = init_params(k_par, hidden_channels, intermediate_channels,
                         output_channels, num_layers)
    kparams = prepare_kernel_params(params, hidden_channels, intermediate_channels,
                                    output_channels, num_layers)

    fwd = jax.jit(functools.partial(lobe_forward,
                                    hidden_channels=hidden_channels,
                                    output_channels=output_channels,
                                    num_layers=num_layers))
    out = jax.block_until_ready(fwd(data, kparams))

    ref = lobe_reference(data, params, num_layers)
    assert out.shape == (batch, output_channels)
    assert jnp.allclose(out, ref, atol=2e-4, rtol=2e-4), "mismatch vs JAX reference"

    print("KERNEL_OK")
</pallas_src>

<mosaic_0001>
module attributes {stable_mosaic.version = 11 : i64} {
  func.func @kernel(%arg0: i32, %arg1: memref<8x128xf32, #tpu.memory_space<vmem>>, %arg2: memref<128x896xf32, #tpu.memory_space<vmem>>, %arg3: memref<128x128xf32, #tpu.memory_space<vmem>>, %arg4: memref<1x128xf32, #tpu.memory_space<vmem>>, %arg5: memref<128x256xf32, #tpu.memory_space<vmem>>, %arg6: memref<1x128xf32, #tpu.memory_space<vmem>>, %arg7: memref<1x128xf32, #tpu.memory_space<vmem>>, %arg8: memref<128x128xf32, #tpu.memory_space<vmem>>, %arg9: memref<128x128xf32, #tpu.memory_space<vmem>>, %arg10: memref<128x128xf32, #tpu.memory_space<vmem>>, %arg11: memref<1x128xf32, #tpu.memory_space<vmem>>, %arg12: memref<128x128xf32, #tpu.memory_space<vmem>>, %arg13: memref<1x128xf32, #tpu.memory_space<vmem>>, %arg14: memref<128x128xf32, #tpu.memory_space<vmem>>, %arg15: memref<1x128xf32, #tpu.memory_space<vmem>>, %arg16: memref<128x128xf32, #tpu.memory_space<vmem>>, %arg17: memref<1x128xf32, #tpu.memory_space<vmem>>, %arg18: memref<128x128xf32, #tpu.memory_space<vmem>>, %arg19: memref<1x128xf32, #tpu.memory_space<vmem>>, %arg20: memref<8x128xf32, #tpu.memory_space<vmem>>) attributes {dimension_semantics = [#tpu.dimension_semantics<parallel>], iteration_bounds = array<i64: 1>, scalar_prefetch = 0 : i64, scratch_operands = 0 : i64, tpu.core_type = #tpu.core_type<tc>, window_params = [{transform_indices = @transform_0, window_bounds = array<i64: 8, 128>}, {pipeline_mode = #tpu.pipeline_mode<synchronous>, transform_indices = @transform_1, window_bounds = array<i64: 128, 896>}, {pipeline_mode = #tpu.pipeline_mode<synchronous>, transform_indices = @transform_2, window_bounds = array<i64: 128, 128>}, {pipeline_mode = #tpu.pipeline_mode<synchronous>, transform_indices = @transform_3, window_bounds = array<i64: 1, 128>}, {pipeline_mode = #tpu.pipeline_mode<synchronous>, transform_indices = @transform_4, window_bounds = array<i64: 128, 256>}, {pipeline_mode = #tpu.pipeline_mode<synchronous>, transform_indices = @transform_5, window_bounds = array<i64: 1, 128>}, {pipeline_mode = #tpu.pipeline_mode<synchronous>, transform_indices = @transform_6, window_bounds = array<i64: 1, 128>}, {pipeline_mode = #tpu.pipeline_mode<synchronous>, transform_indices = @transform_7, window_bounds = array<i64: 128, 128>}, {pipeline_mode = #tpu.pipeline_mode<synchronous>, transform_indices = @transform_8, window_bounds = array<i64: 128, 128>}, {pipeline_mode = #tpu.pipeline_mode<synchronous>, transform_indices = @transform_9, window_bounds = array<i64: 128, 128>}, {pipeline_mode = #tpu.pipeline_mode<synchronous>, transform_indices = @transform_10, window_bounds = array<i64: 1, 128>}, {pipeline_mode = #tpu.pipeline_mode<synchronous>, transform_indices = @transform_11, window_bounds = array<i64: 128, 128>}, {pipeline_mode = #tpu.pipeline_mode<synchronous>, transform_indices = @transform_12, window_bounds = array<i64: 1, 128>}, {pipeline_mode = #tpu.pipeline_mode<synchronous>, transform_indices = @transform_13, window_bounds = array<i64: 128, 128>}, {pipeline_mode = #tpu.pipeline_mode<synchronous>, transform_indices = @transform_14, window_bounds = array<i64: 1, 128>}, {pipeline_mode = #tpu.pipeline_mode<synchronous>, transform_indices = @transform_15, window_bounds = array<i64: 128, 128>}, {pipeline_mode = #tpu.pipeline_mode<synchronous>, transform_indices = @transform_16, window_bounds = array<i64: 1, 128>}, {pipeline_mode = #tpu.pipeline_mode<synchronous>, transform_indices = @transform_17, window_bounds = array<i64: 128, 128>}, {pipeline_mode = #tpu.pipeline_mode<synchronous>, transform_indices = @transform_18, window_bounds = array<i64: 1, 128>}, {transform_indices = @transform_19, window_bounds = array<i64: 8, 128>}]} {
    %c0 = arith.constant 0 : index
    %c0_0 = arith.constant 0 : index
    %0 = vector.load %arg1[%c0, %c0_0] : memref<8x128xf32, #tpu.memory_space<vmem>>, vector<8x128xf32>
    %c0_1 = arith.constant 0 : index
    %c0_2 = arith.constant 0 : index
    %1 = vector.load %arg2[%c0_1, %c0_2] : memref<128x896xf32, #tpu.memory_space<vmem>>, vector<128x896xf32>
    %cst = arith.constant dense<0.000000e+00> : vector<8x896xf32>
    %2 = tpu.matmul %0, %1, %cst {dimension_numbers = #tpu.dot_dimension_numbers<[1], [0], [0], [1], [0, 0, 1, 1], [], []>} : vector<8x128xf32>, vector<128x896xf32>, vector<8x896xf32> -> vector<8x896xf32>
    %3 = vector.extract_strided_slice %2 {offsets = [0, 0], sizes = [8, 128], strides = [1, 1]} : vector<8x896xf32> to vector<8x128xf32>
    %4 = vector.extract_strided_slice %2 {offsets = [0, 128], sizes = [8, 128], strides = [1, 1]} : vector<8x896xf32> to vector<8x128xf32>
    %5 = vector.extract_strided_slice %2 {offsets = [0, 256], sizes = [8, 128], strides = [1, 1]} : vector<8x896xf32> to vector<8x128xf32>
    %6 = vector.extract_strided_slice %2 {offsets = [0, 384], sizes = [8, 128], strides = [1, 1]} : vector<8x896xf32> to vector<8x128xf32>
    %7 = vector.extract_strided_slice %2 {offsets = [0, 512], sizes = [8, 128], strides = [1, 1]} : vector<8x896xf32> to vector<8x128xf32>
    %8 = vector.extract_strided_slice %2 {offsets = [0, 640], sizes = [8, 128], strides = [1, 1]} : vector<8x896xf32> to vector<8x128xf32>
    %9 = vector.extract_strided_slice %2 {offsets = [0, 768], sizes = [8, 128], strides = [1, 1]} : vector<8x896xf32> to vector<8x128xf32>
    %10 = arith.mulf %3, %3 : vector<8x128xf32>
    %11 = arith.mulf %4, %4 : vector<8x128xf32>
    %12 = arith.addf %10, %11 : vector<8x128xf32>
    %13 = arith.mulf %5, %5 : vector<8x128xf32>
    %14 = arith.addf %12, %13 : vector<8x128xf32>
    %15 = math.sqrt %14 : vector<8x128xf32>
    %c0_3 = arith.constant 0 : index
    %c0_4 = arith.constant 0 : index
    %16 = vector.load %arg3[%c0_3, %c0_4] : memref<128x128xf32, #tpu.memory_space<vmem>>, vector<128x128xf32>
    %cst_5 = arith.constant dense<0.000000e+00> : vector<8x128xf32>
    %17 = tpu.matmul %15, %16, %cst_5 {dimension_numbers = #tpu.dot_dimension_numbers<[1], [0], [0], [1], [0, 0, 1, 1], [], []>} : vector<8x128xf32>, vector<128x128xf32>, vector<8x128xf32> -> vector<8x128xf32>
    %18 = arith.addf %9, %17 : vector<8x128xf32>
    %c0_6 = arith.constant 0 : index
    %c0_7 = arith.constant 0 : index
    %19 = vector.load %arg4[%c0_6, %c0_7] : memref<1x128xf32, #tpu.memory_space<vmem>>, vector<1x128xf32>
    %20 = vector.broadcast %19 : vector<1x128xf32> to vector<8x128xf32>
    %21 = arith.addf %18, %20 : vector<8x128xf32>
    %22 = math.absf %21 : vector<8x128xf32>
    %cst_8 = arith.constant 0.000000e+00 : f32
    %23 = vector.broadcast %cst_8 : f32 to vector<8x128xf32>
    %24 = arith.subf %23, %22 : vector<8x128xf32>
    %25 = math.exp %24 : vector<8x128xf32>
    %cst_9 = arith.constant 1.000000e+00 : f32
    %26 = vector.broadcast %cst_9 : f32 to vector<8x128xf32>
    %27 = arith.addf %26, %25 : vector<8x128xf32>
    %cst_10 = arith.constant 1.000000e+00 : f32
    %28 = vector.broadcast %cst_10 : f32 to vector<8x128xf32>
    %29 = arith.divf %28, %27 : vector<8x128xf32>
    %cst_11 = arith.constant 0.000000e+00 : f32
    %30 = vector.broadcast %cst_11 : f32 to vector<8x128xf32>
    %31 = arith.cmpf oge, %21, %30 : vector<8x128xf32>
    %cst_12 = arith.constant 1.000000e+00 : f32
    %32 = vector.broadcast %cst_12 : f32 to vector<8x128xf32>
    %33 = arith.subf %32, %29 : vector<8x128xf32>
    %34 = arith.select %31, %29, %33 : vector<8x128xi1>, vector<8x128xf32>
    %35 = arith.mulf %21, %34 : vector<8x128xf32>
    %c0_13 = arith.constant 0 : index
    %c0_14 = arith.constant 0 : index
    %36 = vector.load %arg5[%c0_13, %c0_14] : memref<128x256xf32, #tpu.memory_space<vmem>>, vector<128x256xf32>
    %cst_15 = arith.constant dense<0.000000e+00> : vector<8x256xf32>
    %37 = tpu.matmul %35, %36, %cst_15 {dimension_numbers = #tpu.dot_dimension_numbers<[1], [0], [0], [1], [0, 0, 1, 1], [], []>} : vector<8x128xf32>, vector<128x256xf32>, vector<8x256xf32> -> vector<8x256xf32>
    %38 = vector.extract_strided_slice %37 {offsets = [0, 0], sizes = [8, 128], strides = [1, 1]} : vector<8x256xf32> to vector<8x128xf32>
    %c0_16 = arith.constant 0 : index
    %c0_17 = arith.constant 0 : index
    %39 = vector.load %arg6[%c0_16, %c0_17] : memref<1x128xf32, #tpu.memory_space<vmem>>, vector<1x128xf32>
    %40 = vector.broadcast %39 : vector<1x128xf32> to vector<8x128xf32>
    %41 = arith.addf %38, %40 : vector<8x128xf32>
    %42 = math.absf %41 : vector<8x128xf32>
    %cst_18 = arith.constant 0.000000e+00 : f32
    %43 = vector.broadcast %cst_18 : f32 to vector<8x128xf32>
    %44 = arith.subf %43, %42 : vector<8x128xf32>
    %45 = math.exp %44 : vector<8x128xf32>
    %cst_19 = arith.constant 1.000000e+00 : f32
    %46 = vector.broadcast %cst_19 : f32 to vector<8x128xf32>
    %47 = arith.addf %46, %45 : vector<8x128xf32>
    %cst_20 = arith.constant 1.000000e+00 : f32
    %48 = vector.broadcast %cst_20 : f32 to vector<8x128xf32>
    %49 = arith.divf %48, %47 : vector<8x128xf32>
    %cst_21 = arith.constant 0.000000e+00 : f32
    %50 = vector.broadcast %cst_21 : f32 to vector<8x128xf32>
    %51 = arith.cmpf oge, %41, %50 : vector<8x128xf32>
    %cst_22 = arith.constant 1.000000e+00 : f32
    %52 = vector.broadcast %cst_22 : f32 to vector<8x128xf32>
    %53 = arith.subf %52, %49 : vector<8x128xf32>
    %54 = arith.select %51, %49, %53 : vector<8x128xi1>, vector<8x128xf32>
    %55 = arith.mulf %41, %54 : vector<8x128xf32>
    %56 = vector.extract_strided_slice %37 {offsets = [0, 128], sizes = [8, 128], strides = [1, 1]} : vector<8x256xf32> to vector<8x128xf32>
    %c0_23 = arith.constant 0 : index
    %c0_24 = arith.constant 0 : index
    %57 = vector.load %arg7[%c0_23, %c0_24] : memref<1x128xf32, #tpu.memory_space<vmem>>, vector<1x128xf32>
    %58 = vector.broadcast %57 : vector<1x128xf32> to vector<8x128xf32>
    %59 = arith.addf %56, %58 : vector<8x128xf32>
    %60 = arith.mulf %59, %6 : vector<8x128xf32>
    %61 = arith.mulf %59, %7 : vector<8x128xf32>
    %62 = arith.mulf %59, %8 : vector<8x128xf32>
    %63 = tpu.concatenate %60, %61, %62 in 0 : vector<8x128xf32>, vector<8x128xf32>, vector<8x128xf32> -> vector<24x128xf32>
    %c0_25 = arith.constant 0 : index
    %c0_26 = arith.constant 0 : index
    %64 = vector.load %arg8[%c0_25, %c0_26] : memref<128x128xf32, #tpu.memory_space<vmem>>, vector<128x128xf32>
    %cst_27 = arith.constant dense<0.000000e+00> : vector<24x128xf32>
    %65 = tpu.matmul %63, %64, %cst_27 {dimension_numbers = #tpu.dot_dimension_numbers<[1], [0], [0], [1], [0, 0, 1, 1], [], []>} : vector<24x128xf32>, vector<128x128xf32>, vector<24x128xf32> -> vector<24x128xf32>
    %66 = vector.extract_strided_slice %65 {offsets = [0, 0], sizes = [8, 128], strides = [1, 1]} : vector<24x128xf32> to vector<8x128xf32>
    %67 = vector.extract_strided_slice %65 {offsets = [8, 0], sizes = [8, 128], strides = [1, 1]} : vector<24x128xf32> to vector<8x128xf32>
    %68 = vector.extract_strided_slice %65 {offsets = [16, 0], sizes = [8, 128], strides = [1, 1]} : vector<24x128xf32> to vector<8x128xf32>
    %69 = arith.mulf %66, %66 : vector<8x128xf32>
    %70 = arith.mulf %67, %67 : vector<8x128xf32>
    %71 = arith.addf %69, %70 : vector<8x128xf32>
    %72 = arith.mulf %68, %68 : vector<8x128xf32>
    %73 = arith.addf %71, %72 : vector<8x128xf32>
    %74 = math.sqrt %73 : vector<8x128xf32>
    %c0_28 = arith.constant 0 : index
    %c0_29 = arith.constant 0 : index
    %75 = vector.load %arg9[%c0_28, %c0_29] : memref<128x128xf32, #tpu.memory_space<vmem>>, vector<128x128xf32>
    %cst_30 = arith.constant dense<0.000000e+00> : vector<8x128xf32>
    %76 = tpu.matmul %55, %75, %cst_30 {dimension_numbers = #tpu.dot_dimension_numbers<[1], [0], [0], [1], [0, 0, 1, 1], [], []>} : vector<8x128xf32>, vector<128x128xf32>, vector<8x128xf32> -> vector<8x128xf32>
    %c0_31 = arith.constant 0 : index
    %c0_32 = arith.constant 0 : index
    %77 = vector.load %arg10[%c0_31, %c0_32] : memref<128x128xf32, #tpu.memory_space<vmem>>, vector<128x128xf32>
    %cst_33 = arith.constant dense<0.000000e+00> : vector<8x128xf32>
    %78 = tpu.matmul %74, %77, %cst_33 {dimension_numbers = #tpu.dot_dimension_numbers<[1], [0], [0], [1], [0, 0, 1, 1], [], []>} : vector<8x128xf32>, vector<128x128xf32>, vector<8x128xf32> -> vector<8x128xf32>
    %79 = arith.addf %76, %78 : vector<8x128xf32>
    %c0_34 = arith.constant 0 : index
    %c0_35 = arith.constant 0 : index
    %80 = vector.load %arg11[%c0_34, %c0_35] : memref<1x128xf32, #tpu.memory_space<vmem>>, vector<1x128xf32>
    %81 = vector.broadcast %80 : vector<1x128xf32> to vector<8x128xf32>
    %82 = arith.addf %79, %81 : vector<8x128xf32>
    %83 = math.absf %82 : vector<8x128xf32>
    %cst_36 = arith.constant 0.000000e+00 : f32
    %84 = vector.broadcast %cst_36 : f32 to vector<8x128xf32>
    %85 = arith.subf %84, %83 : vector<8x128xf32>
    %86 = math.exp %85 : vector<8x128xf32>
    %cst_37 = arith.constant 1.000000e+00 : f32
    %87 = vector.broadcast %cst_37 : f32 to vector<8x128xf32>
    %88 = arith.addf %87, %86 : vector<8x128xf32>
    %cst_38 = arith.constant 1.000000e+00 : f32
    %89 = vector.broadcast %cst_38 : f32 to vector<8x128xf32>
    %90 = arith.divf %89, %88 : vector<8x128xf32>
    %cst_39 = arith.constant 0.000000e+00 : f32
    %91 = vector.broadcast %cst_39 : f32 to vector<8x128xf32>
    %92 = arith.cmpf oge, %82, %91 : vector<8x128xf32>
    %cst_40 = arith.constant 1.000000e+00 : f32
    %93 = vector.broadcast %cst_40 : f32 to vector<8x128xf32>
    %94 = arith.subf %93, %90 : vector<8x128xf32>
    %95 = arith.select %92, %90, %94 : vector<8x128xi1>, vector<8x128xf32>
    %96 = arith.mulf %82, %95 : vector<8x128xf32>
    %c0_41 = arith.constant 0 : index
    %c0_42 = arith.constant 0 : index
    %97 = vector.load %arg12[%c0_41, %c0_42] : memref<128x128xf32, #tpu.memory_space<vmem>>, vector<128x128xf32>
    %cst_43 = arith.constant dense<0.000000e+00> : vector<8x128xf32>
    %98 = tpu.matmul %96, %97, %cst_43 {dimension_numbers = #tpu.dot_dimension_numbers<[1], [0], [0], [1], [0, 0, 1, 1], [], []>} : vector<8x128xf32>, vector<128x128xf32>, vector<8x128xf32> -> vector<8x128xf32>
    %c0_44 = arith.constant 0 : index
    %c0_45 = arith.constant 0 : index
    %99 = vector.load %arg13[%c0_44, %c0_45] : memref<1x128xf32, #tpu.memory_space<vmem>>, vector<1x128xf32>
    %100 = vector.broadcast %99 : vector<1x128xf32> to vector<8x128xf32>
    %101 = arith.addf %98, %100 : vector<8x128xf32>
    %c0_46 = arith.constant 0 : index
    %c0_47 = arith.constant 0 : index
    %102 = vector.load %arg14[%c0_46, %c0_47] : memref<128x128xf32, #tpu.memory_space<vmem>>, vector<128x128xf32>
    %cst_48 = arith.constant dense<0.000000e+00> : vector<8x128xf32>
    %103 = tpu.matmul %101, %102, %cst_48 {dimension_numbers = #tpu.dot_dimension_numbers<[1], [0], [0], [1], [0, 0, 1, 1], [], []>} : vector<8x128xf32>, vector<128x128xf32>, vector<8x128xf32> -> vector<8x128xf32>
    %c0_49 = arith.constant 0 : index
    %c0_50 = arith.constant 0 : index
    %104 = vector.load %arg15[%c0_49, %c0_50] : memref<1x128xf32, #tpu.memory_space<vmem>>, vector<1x128xf32>
    %105 = vector.broadcast %104 : vector<1x128xf32> to vector<8x128xf32>
    %106 = arith.addf %103, %105 : vector<8x128xf32>
    %cst_51 = arith.constant 0.000000e+00 : f32
    %107 = vector.broadcast %cst_51 : f32 to vector<8x128xf32>
    %108 = arith.maximumf %106, %107 : vector<8x128xf32>
    %c0_52 = arith.constant 0 : index
    %c0_53 = arith.constant 0 : index
    %109 = vector.load %arg16[%c0_52, %c0_53] : memref<128x128xf32, #tpu.memory_space<vmem>>, vector<128x128xf32>
    %cst_54 = arith.constant dense<0.000000e+00> : vector<8x128xf32>
    %110 = tpu.matmul %108, %109, %cst_54 {dimension_numbers = #tpu.dot_dimension_numbers<[1], [0], [0], [1], [0, 0, 1, 1], [], []>} : vector<8x128xf32>, vector<128x128xf32>, vector<8x128xf32> -> vector<8x128xf32>
    %c0_55 = arith.constant 0 : index
    %c0_56 = arith.constant 0 : index
    %111 = vector.load %arg17[%c0_55, %c0_56] : memref<1x128xf32, #tpu.memory_space<vmem>>, vector<1x128xf32>
    %112 = vector.broadcast %111 : vector<1x128xf32> to vector<8x128xf32>
    %113 = arith.addf %110, %112 : vector<8x128xf32>
    %cst_57 = arith.constant 0.000000e+00 : f32
    %114 = vector.broadcast %cst_57 : f32 to vector<8x128xf32>
    %115 = arith.maximumf %113, %114 : vector<8x128xf32>
    %c0_58 = arith.constant 0 : index
    %c0_59 = arith.constant 0 : index
    %116 = vector.load %arg18[%c0_58, %c0_59] : memref<128x128xf32, #tpu.memory_space<vmem>>, vector<128x128xf32>
    %cst_60 = arith.constant dense<0.000000e+00> : vector<8x128xf32>
    %117 = tpu.matmul %115, %116, %cst_60 {dimension_numbers = #tpu.dot_dimension_numbers<[1], [0], [0], [1], [0, 0, 1, 1], [], []>} : vector<8x128xf32>, vector<128x128xf32>, vector<8x128xf32> -> vector<8x128xf32>
    %c0_61 = arith.constant 0 : index
    %c0_62 = arith.constant 0 : index
    %118 = vector.load %arg19[%c0_61, %c0_62] : memref<1x128xf32, #tpu.memory_space<vmem>>, vector<1x128xf32>
    %119 = vector.broadcast %118 : vector<1x128xf32> to vector<8x128xf32>
    %120 = arith.addf %117, %119 : vector<8x128xf32>
    %c0_63 = arith.constant 0 : index
    %c0_64 = arith.constant 0 : index
    %121 = vector.load %arg20[%c0_63, %c0_64] : memref<8x128xf32, #tpu.memory_space<vmem>>, vector<8x128xf32>
    tpu.vector_store %arg20[%c0_63, %c0_64], %120 {strides = array<i32>} : memref<8x128xf32, #tpu.memory_space<vmem>>, vector<8x128xf32>,
    return
  }
  func.func @transform_0(%arg0: i32) -> (i32, i32) {
    %c0_i32 = arith.constant 0 : i32
    %c0_i32_0 = arith.constant 0 : i32
    return %arg0, %c0_i32 : i32, i32
  }
  func.func @transform_1(%arg0: i32) -> (i32, i32) {
    %c0_i32 = arith.constant 0 : i32
    %c0_i32_0 = arith.constant 0 : i32
    %c0_i32_1 = arith.constant 0 : i32
    return %c0_i32, %c0_i32_0 : i32, i32
  }
  func.func @transform_2(%arg0: i32) -> (i32, i32) {
    %c0_i32 = arith.constant 0 : i32
    %c0_i32_0 = arith.constant 0 : i32
    %c0_i32_1 = arith.constant 0 : i32
    return %c0_i32, %c0_i32_0 : i32, i32
  }
  func.func @transform_3(%arg0: i32) -> (i32, i32) {
    %c0_i32 = arith.constant 0 : i32
    %c0_i32_0 = arith.constant 0 : i32
    %c0_i32_1 = arith.constant 0 : i32
    return %c0_i32, %c0_i32_0 : i32, i32
  }
  func.func @transform_4(%arg0: i32) -> (i32, i32) {
    %c0_i32 = arith.constant 0 : i32
    %c0_i32_0 = arith.constant 0 : i32
    %c0_i32_1 = arith.constant 0 : i32
    return %c0_i32, %c0_i32_0 : i32, i32
  }
  func.func @transform_5(%arg0: i32) -> (i32, i32) {
    %c0_i32 = arith.constant 0 : i32
    %c0_i32_0 = arith.constant 0 : i32
    %c0_i32_1 = arith.constant 0 : i32
    return %c0_i32, %c0_i32_0 : i32, i32
  }
  func.func @transform_6(%arg0: i32) -> (i32, i32) {
    %c0_i32 = arith.constant 0 : i32
    %c0_i32_0 = arith.constant 0 : i32
    %c0_i32_1 = arith.constant 0 : i32
    return %c0_i32, %c0_i32_0 : i32, i32
  }
  func.func @transform_7(%arg0: i32) -> (i32, i32) {
    %c0_i32 = arith.constant 0 : i32
    %c0_i32_0 = arith.constant 0 : i32
    %c0_i32_1 = arith.constant 0 : i32
    return %c0_i32, %c0_i32_0 : i32, i32
  }
  func.func @transform_8(%arg0: i32) -> (i32, i32) {
    %c0_i32 = arith.constant 0 : i32
    %c0_i32_0 = arith.constant 0 : i32
    %c0_i32_1 = arith.constant 0 : i32
    return %c0_i32, %c0_i32_0 : i32, i32
  }
  func.func @transform_9(%arg0: i32) -> (i32, i32) {
    %c0_i32 = arith.constant 0 : i32
    %c0_i32_0 = arith.constant 0 : i32
    %c0_i32_1 = arith.constant 0 : i32
    return %c0_i32, %c0_i32_0 : i32, i32
  }
  func.func @transform_10(%arg0: i32) -> (i32, i32) {
    %c0_i32 = arith.constant 0 : i32
    %c0_i32_0 = arith.constant 0 : i32
    %c0_i32_1 = arith.constant 0 : i32
    return %c0_i32, %c0_i32_0 : i32, i32
  }
  func.func @transform_11(%arg0: i32) -> (i32, i32) {
    %c0_i32 = arith.constant 0 : i32
    %c0_i32_0 = arith.constant 0 : i32
    %c0_i32_1 = arith.constant 0 : i32
    return %c0_i32, %c0_i32_0 : i32, i32
  }
  func.func @transform_12(%arg0: i32) -> (i32, i32) {
    %c0_i32 = arith.constant 0 : i32
    %c0_i32_0 = arith.constant 0 : i32
    %c0_i32_1 = arith.constant 0 : i32
    return %c0_i32, %c0_i32_0 : i32, i32
  }
  func.func @transform_13(%arg0: i32) -> (i32, i32) {
    %c0_i32 = arith.constant 0 : i32
    %c0_i32_0 = arith.constant 0 : i32
    %c0_i32_1 = arith.constant 0 : i32
    return %c0_i32, %c0_i32_0 : i32, i32
  }
  func.func @transform_14(%arg0: i32) -> (i32, i32) {
    %c0_i32 = arith.constant 0 : i32
    %c0_i32_0 = arith.constant 0 : i32
    %c0_i32_1 = arith.constant 0 : i32
    return %c0_i32, %c0_i32_0 : i32, i32
  }
  func.func @transform_15(%arg0: i32) -> (i32, i32) {
    %c0_i32 = arith.constant 0 : i32
    %c0_i32_0 = arith.constant 0 : i32
    %c0_i32_1 = arith.constant 0 : i32
    return %c0_i32, %c0_i32_0 : i32, i32
  }
  func.func @transform_16(%arg0: i32) -> (i32, i32) {
    %c0_i32 = arith.constant 0 : i32
    %c0_i32_0 = arith.constant 0 : i32
    %c0_i32_1 = arith.constant 0 : i32
    return %c0_i32, %c0_i32_0 : i32, i32
  }
  func.func @transform_17(%arg0: i32) -> (i32, i32) {
    %c0_i32 = arith.constant 0 : i32
    %c0_i32_0 = arith.constant 0 : i32
    %c0_i32_1 = arith.constant 0 : i32
    return %c0_i32, %c0_i32_0 : i32, i32
  }
  func.func @transform_18(%arg0: i32) -> (i32, i32) {
    %c0_i32 = arith.constant 0 : i32
    %c0_i32_0 = arith.constant 0 : i32
    %c0_i32_1 = arith.constant 0 : i32
    return %c0_i32, %c0_i32_0 : i32, i32
  }
  func.func @transform_19(%arg0: i32) -> (i32, i32) {
    %c0_i32 = arith.constant 0 : i32
    %c0_i32_0 = arith.constant 0 : i32
    return %arg0, %c0_i32 : i32, i32
  }
}

</mosaic_0001>

<bundles_post_ra>
// kernel: lobe_forward.1
= control target key start
LH: loop header
LB: loop body
LE: loop exit
PB: predicated region body
PF: predicated region fallthrough
CT: control target
= control target key end

     0   :  { %s2686_s0 = inlined_call_operand.vmem [shape: f32[8,128], index: 0, kind: input, shape index: {}]   ;;  %s2687_s1 = inlined_call_operand.hbm [shape: f32[128,896], index: 1, kind: input, shape index: {}]   ;;  %s2688_s2 = inlined_call_operand.hbm [shape: f32[128,128], index: 2, kind: input, shape index: {}]   ;;  %s2689_s3 = inlined_call_operand.vmem [shape: f32[1,128], index: 3, kind: input, shape index: {}]   ;;  %s2690_s4 = inlined_call_operand.hbm [shape: f32[128,256], index: 4, kind: input, shape index: {}]   ;;  %s2691_s5 = inlined_call_operand.vmem [shape: f32[1,128], index: 5, kind: input, shape index: {}]   ;;  %s2692_s6 = inlined_call_operand.vmem [shape: f32[1,128], index: 6, kind: input, shape index: {}]   ;;  %s2693_s7 = inlined_call_operand.hbm [shape: f32[128,128], index: 7, kind: input, shape index: {}]   ;;  %s2694_s8 = inlined_call_operand.hbm [shape: f32[128,128], index: 8, kind: input, shape index: {}]   ;;  %s2695_s9 = inlined_call_operand.hbm [shape: f32[128,128], index: 9, kind: input, shape index: {}]   ;;  %s2696_s10 = inlined_call_operand.vmem [shape: f32[1,128], index: 10, kind: input, shape index: {}]   ;;  %s2697_s11 = inlined_call_operand.hbm [shape: f32[128,128], index: 11, kind: input, shape index: {}]   ;;  %s2698_s12 = inlined_call_operand.vmem [shape: f32[1,128], index: 12, kind: input, shape index: {}]   ;;  %s2699_s13 = inlined_call_operand.hbm [shape: f32[128,128], index: 13, kind: input, shape index: {}]   ;;  %s2700_s14 = inlined_call_operand.vmem [shape: f32[1,128], index: 14, kind: input, shape index: {}]   ;;  %s2701_s15 = inlined_call_operand.hbm [shape: f32[128,128], index: 15, kind: input, shape index: {}]   ;;  %s2702_s16 = inlined_call_operand.vmem [shape: f32[1,128], index: 16, kind: input, shape index: {}]   ;;  %s2703_s17 = inlined_call_operand.hbm [shape: f32[128,128], index: 17, kind: input, shape index: {}]   ;;  %s2704_s18 = inlined_call_operand.vmem [shape: f32[1,128], index: 18, kind: input, shape index: {}]   ;;  %s2705_s19 = inlined_call_operand.hbm [shape: f32[8,128], index: 19, kind: output, shape index: {}]  }
   0x1   :  { %2706 = sst [smem:[#allocation27_spill]] %s2686_s0 }
   0x2   :  { %2707 = sst [smem:[#allocation28_spill]] %s2687_s1 }
   0x3   :  { %2708 = sst [smem:[#allocation29_spill]] %s2688_s2 }
   0x4   :  { %2709 = sst [smem:[#allocation30_spill]] %s2689_s3 }
   0x5   :  { %24 = vsyncpa [#allocation3], 0 }
   0x6   :  { %25 = vsyncpa [#allocation6], 0 }
   0x7   :  { %26 = vsyncpa [#allocation9], 0 }
   0x8   :  { %27 = vsyncpa [#allocation12], 0 }
   0x9   :  { %28 = vsyncpa [#allocation15], 0 }
   0xa   :  { %29 = vsyncpa [#allocation18], 0 }
   0xb   :  { %30 = vsyncpa [#allocation4], 0  ;;  %s2293_s0 = smov [#allocation5]  }
   0xc   :  { %s50_s30 = sshll.u32 %s2293_s0, 4  ;;  %s51_s30 = int_to_ptr.vmem [resolvable:$true] %s50_s30 }
   0xd   :  { %s2067_s20 = scalar_lea.vmem %s51_s30, 2048  ;;  %p2072_p1 = scmp.lt.s32.totalorder %s51_s30, %s51_s30 }
   0xe   :  { %p2068_p0 = scmp.ne.s32.totalorder %s51_s30, %s2067_s20  ;;  %p2073_p2 = scmp.lt.s32.totalorder %s2067_s20, %s2067_s20 }
  0x10   :  { %p2074_p3 = por %p2073_p2, %p2072_p1 }
  0x12   :  { %p2075_p4 = pnand %p2074_p3, %p2068_p0 }
  0x14   :  { %2078 = shalt.err (!%p2075_p4)
}
  0x15   :  { %s2294_s21 = smov 128   ;;  %s2295_s1 = smov 8  }
  0x16   :  { %s2710_s23 = sld [smem:[#allocation29_spill]]  ;;  %s2296_s24 = smov [#allocation8]  }
  0x17   :  { %s80_s25 = sshll.u32 %s2296_s24, 4  ;;  %s2297_s3 = smov [#allocation11]   ;;  %s81_s25 = int_to_ptr.vmem [resolvable:$true] %s80_s25 }
  0x18   :  { %s104_s26 = sshll.u32 %s2297_s3, 4  ;;  %s2087_s27 = scalar_lea.vmem %s81_s25, 2048  ;;  %s105_s26 = int_to_ptr.vmem [resolvable:$true] %s104_s26 }
  0x19   :  { %p2088_p5 = scmp.ne.s32.totalorder %s81_s25, %s2087_s27  ;;  %p2092_p6 = scmp.lt.s32.totalorder %s81_s25, %s81_s25 }
  0x1a   :  { %p2093_p7 = scmp.lt.s32.totalorder %s2087_s27, %s2087_s27 }
  0x1c   :  { %56 = dma.hbm_to_vmem [thread:$0]  %s2710_s23, 2048, %s51_s30, [#allocation6], %s2294_s21, %s2294_s21, %s2295_s1  }
  0x1d   :  { %p2094_p8 = por %p2093_p7, %p2092_p6 }
  0x1f   :  { %p2095_p9 = pnand %p2094_p8, %p2088_p5 }
  0x21   :  { %2098 = shalt.err (!%p2095_p9)
}
  0x22   :  { %86 = dma.hbm_to_vmem [thread:$0]  %s2693_s7, 2048, %s81_s25, [#allocation9], %s2294_s21, %s2294_s21, %s2295_s1  }
  0x23   :  { %s2107_s0 = scalar_lea.vmem %s105_s26, 2048  ;;  %p2112_p11 = scmp.lt.s32.totalorder %s105_s26, %s105_s26 }
  0x24   :  { %p2108_p10 = scmp.ne.s32.totalorder %s105_s26, %s2107_s0  ;;  %p2113_p12 = scmp.lt.s32.totalorder %s2107_s0, %s2107_s0 }
  0x26   :  { %p2114_p13 = por %p2113_p12, %p2112_p11 }
  0x28   :  { %p2115_p0 = pnand %p2114_p13, %p2108_p10 }
  0x2a   :  { %2118 = shalt.err (!%p2115_p0)
}
  0x2b   :  { %110 = dma.hbm_to_vmem [thread:$0]  %s2695_s9, 2048, %s105_s26, [#allocation12], %s2294_s21, %s2294_s21, %s2295_s1  }
  0x2c   :  { %s2298_s22 = smov [#allocation14]   ;;  %s2299_s23 = smov [#allocation2]  }
  0x2d   :  { %s132_s2 = sshll.u32 %s2298_s22, 4  ;;  %s38_s7 = sshll.u32 %s2299_s23, 4  ;;  %s133_s2 = int_to_ptr.vmem [resolvable:$true] %s132_s2  ;;  %s39_s7 = int_to_ptr.vmem [resolvable:$true] %s38_s7 }
  0x2e   :  { %s2127_s24 = scalar_lea.vmem %s133_s2, 2048  ;;  %p2132_p2 = scmp.lt.s32.totalorder %s133_s2, %s133_s2 }
  0x2f   :  { %p2128_p1 = scmp.ne.s32.totalorder %s133_s2, %s2127_s24  ;;  %p2133_p3 = scmp.lt.s32.totalorder %s2127_s24, %s2127_s24 }
  0x31   :  { %p2134_p4 = por %p2133_p3, %p2132_p2 }
  0x33   :  { %p2135_p5 = pnand %p2134_p4, %p2128_p1 }
  0x35   :  { %2138 = shalt.err (!%p2135_p5)
}
  0x36   :  { %138 = dma.hbm_to_vmem [thread:$0]  %s2699_s13, 2048, %s133_s2, [#allocation15], %s2294_s21, %s2294_s21, %s2295_s1  }
  0x37   :  { %s2147_s9 = scalar_lea.vmem %s39_s7, 14336  ;;  %p2152_p7 = scmp.lt.s32.totalorder %s39_s7, %s39_s7 }
  0x38   :  { %p2148_p6 = scmp.ne.s32.totalorder %s39_s7, %s2147_s9  ;;  %p2153_p8 = scmp.lt.s32.totalorder %s2147_s9, %s2147_s9 }
  0x3a   :  { %p2154_p9 = por %p2153_p8, %p2152_p7 }
  0x3c   :  { %p2155_p10 = pnand %p2154_p9, %p2148_p6 }
  0x3e   :  { %2158 = shalt.err (!%p2155_p10)
}
  0x3f   :  { %s2300_s26 = smov 896   ;;  %s2301_s27 = smov 56  }
  0x40   :  { %s2711_s0 = sld [smem:[#allocation28_spill]]  ;;  %s2302_s30 = smov [#allocation7]  }
  0x41   :  { %s64_s20 = sshll.u32 %s2302_s30, 4  ;;  %s65_s20 = int_to_ptr.vmem [resolvable:$true] %s64_s20 }
  0x42   :  { %s2167_s22 = scalar_lea.vmem %s65_s20, 4096  ;;  %p2172_p12 = scmp.lt.s32.totalorder %s65_s20, %s65_s20 }
  0x43   :  { %p2168_p11 = scmp.ne.s32.totalorder %s65_s20, %s2167_s22  ;;  %p2173_p13 = scmp.lt.s32.totalorder %s2167_s22, %s2167_s22 }
  0x45   :  { %p2174_p0 = por %p2173_p13, %p2172_p12 }
  0x46   :  { %44 = dma.hbm_to_vmem [thread:$0]  %s2711_s0, 14336, %s39_s7, [#allocation3], %s2300_s26, %s2300_s26, %s2301_s27  }
  0x47   :  { %p2175_p1 = pnand %p2174_p0, %p2168_p11 }
  0x49   :  { %2178 = shalt.err (!%p2175_p1)
}
  0x4a   :  { %s2303_s13 = smov 256   ;;  %s2304_s2 = smov 16  }
  0x4b   :  { %70 = dma.hbm_to_vmem [thread:$0]  %s2690_s4, 4096, %s65_s20, [#allocation6], %s2303_s13, %s2303_s13, %s2304_s2  }
  0x4c   :  { %s2305_s25 = smov [#allocation10]   ;;  %s2306_s9 = smov [#allocation13]  }
  0x4d   :  { %s92_s3 = sshll.u32 %s2305_s25, 4  ;;  %s118_s7 = sshll.u32 %s2306_s9, 4  ;;  %s93_s3 = int_to_ptr.vmem [resolvable:$true] %s92_s3  ;;  %s119_s7 = int_to_ptr.vmem [resolvable:$true] %s118_s7 }
  0x4e   :  { %s2187_s26 = scalar_lea.vmem %s93_s3, 2048  ;;  %p2192_p3 = scmp.lt.s32.totalorder %s93_s3, %s93_s3 }
  0x4f   :  { %p2188_p2 = scmp.ne.s32.totalorder %s93_s3, %s2187_s26  ;;  %p2193_p4 = scmp.lt.s32.totalorder %s2187_s26, %s2187_s26 }
  0x51   :  { %p2194_p5 = por %p2193_p4, %p2192_p3 }
  0x53   :  { %p2195_p6 = pnand %p2194_p5, %p2188_p2 }
  0x55   :  { %2198 = shalt.err (!%p2195_p6)
}
  0x56   :  { %98 = dma.hbm_to_vmem [thread:$0]  %s2694_s8, 2048, %s93_s3, [#allocation9], %s2294_s21, %s2294_s21, %s2295_s1  }
  0x57   :  { %s2207_s4 = scalar_lea.vmem %s119_s7, 2048  ;;  %p2212_p8 = scmp.lt.s32.totalorder %s119_s7, %s119_s7 }
  0x58   :  { %p2208_p7 = scmp.ne.s32.totalorder %s119_s7, %s2207_s4  ;;  %p2213_p9 = scmp.lt.s32.totalorder %s2207_s4, %s2207_s4 }
  0x5a   :  { %p2214_p10 = por %p2213_p9, %p2212_p8 }
  0x5c   :  { %p2215_p11 = pnand %p2214_p10, %p2208_p7 }
  0x5e   :  { %2218 = shalt.err (!%p2215_p11)
}
  0x5f   :  { %124 = dma.hbm_to_vmem [thread:$0]  %s2697_s11, 2048, %s119_s7, [#allocation12], %s2294_s21, %s2294_s21, %s2295_s1  }
  0x60   :  { %s2307_s30 = smov [#allocation16]   ;;  %s2308_s22 = smov [#allocation17]  }
  0x61   :  { %s146_s20 = sshll.u32 %s2307_s30, 4  ;;  %s160_s13 = sshll.u32 %s2308_s22, 4  ;;  %s147_s20 = int_to_ptr.vmem [resolvable:$true] %s146_s20  ;;  %s161_s13 = int_to_ptr.vmem [resolvable:$true] %s160_s13 }
  0x62   :  { %s2227_s8 = scalar_lea.vmem %s147_s20, 2048  ;;  %p2232_p13 = scmp.lt.s32.totalorder %s147_s20, %s147_s20 }
  0x63   :  { %p2228_p12 = scmp.ne.s32.totalorder %s147_s20, %s2227_s8  ;;  %p2233_p0 = scmp.lt.s32.totalorder %s2227_s8, %s2227_s8 }
  0x65   :  { %p2234_p1 = por %p2233_p0, %p2232_p13 }
  0x67   :  { %p2235_p2 = pnand %p2234_p1, %p2228_p12 }
  0x69   :  { %2238 = shalt.err (!%p2235_p2)
}
  0x6a   :  { %152 = dma.hbm_to_vmem [thread:$0]  %s2701_s15, 2048, %s147_s20, [#allocation15], %s2294_s21, %s2294_s21, %s2295_s1  }
  0x6b   :  { %s2247_s11 = scalar_lea.vmem %s161_s13, 2048  ;;  %p2252_p4 = scmp.lt.s32.totalorder %s161_s13, %s161_s13 }
  0x6c   :  { %p2248_p3 = scmp.ne.s32.totalorder %s161_s13, %s2247_s11  ;;  %p2253_p5 = scmp.lt.s32.totalorder %s2247_s11, %s2247_s11 }
  0x6e   :  { %p2254_p6 = por %p2253_p5, %p2252_p4 }
  0x70   :  { %p2255_p7 = pnand %p2254_p6, %p2248_p3 }
  0x72   :  { %2258 = shalt.err (!%p2255_p7)
}
  0x73   :  { %166 = dma.hbm_to_vmem [thread:$0]  %s2703_s17, 2048, %s161_s13, [#allocation18], %s2294_s21, %s2294_s21, %s2295_s1  }
  0x74   :  { %2279 = dma.done.wait [#allocation3], 14336  }
  0x75   :  { %2280 = vsyncadd [#allocation3], 4294952960 }
  0x76   :  { %2281 = dma.done.wait [#allocation6], 6144  }
  0x77   :  { %2282 = vsyncadd [#allocation6], 4294961152 }
  0x78   :  { %2283 = dma.done.wait [#allocation9], 4096  }
  0x79   :  { %2284 = vsyncadd [#allocation9], 4294963200 }
  0x7a   :  { %2285 = dma.done.wait [#allocation12], 4096  }
  0x7b   :  { %2286 = vsyncadd [#allocation12], 4294963200 }
  0x7c   :  { %2287 = dma.done.wait [#allocation15], 4096  }
  0x7d   :  { %2288 = vsyncadd [#allocation15], 4294963200 }
  0x7e   :  { %2289 = dma.done.wait [#allocation18], 2048  }
  0x7f   :  { %2290 = vsyncadd [#allocation18], 4294965248  ;;  %v2309_v0 = vmov 0.0   ;;  %v306_v1 = vld [vmem:[#allocation2 + $0x350] sm:$0xff]  ;;  %v305_v2 = vld [vmem:[#allocation2 + $0x348] sm:$0xff]  ;;  %s2712_s21 = sld [smem:[#allocation27_spill]] }
  0x80   :  { %376 = vmatprep.mubr.f32.mxu0 %v2309_v0  ;;  %447 = vmatprep.mubr.f32.mxu1 %v2309_v0  ;;  %v299_v3 = vld [vmem:[#allocation2 + $0x318] sm:$0xff]  ;;  %v308_v4 = vld [vmem:[#allocation2 + $0x360] sm:$0xff]  ;;  %v298_v5 = vld [vmem:[#allocation2 + $0x310] sm:$0xff]  ;;  %vm2310_vm0 = vmmov 0   ;;  %s2713_s9 = sld [smem:[#allocation30_spill]]  ;;  %s2311_s22 = smov [#allocation19]  }
  0x81   :  { %312 = vmatprep.subr.mxu0 %v306_v1  ;;  %v307_v6 = vld [vmem:[#allocation2 + $0x358] sm:$0xff]  ;;  %383 = vmatprep.subr.mxu1 %v308_v4  ;;  %v292_v7 = vld [vmem:[#allocation2 + $0x2e0] sm:$0xff]  ;;  %v301_v8 = vld [vmem:[#allocation2 + $0x328] sm:$0xff]  ;;  %s1526_s13 = sshll.u32 %s2311_s22, 4  ;;  %s1527_s13 = int_to_ptr.vmem [resolvable:$true] %s1526_s13 }
  0x82   :  { %313 = vmatpush1.msra.mxu0 %v305_v2  ;;  %384 = vmatpush1.msra.mxu1 %v307_v6  ;;  %v291_v9 = vld [vmem:[#allocation2 + $0x2d8] sm:$0xff]  ;;  %v300_v10 = vld [vmem:[#allocation2 + $0x320] sm:$0xff]  ;;  %v294_v11 = vld [vmem:[#allocation2 + $0x2f0] sm:$0xff]  ;;  %s2259_s8 = scalar_lea.vmem %s1527_s13, 128  ;;  %p2264_p9 = scmp.lt.s32.totalorder %s1527_s13, %s1527_s13 }
  0x83   :  { %314 = vmatprep.subr.mxu0 %v299_v3  ;;  %385 = vmatprep.subr.mxu1 %v301_v8  ;;  %v285_v12 = vld [vmem:[#allocation2 + $0x2a8] sm:$0xff]  ;;  %v284_v14 = vld [vmem:[#allocation2 + $0x2a0] sm:$0xff]  ;;  %v287_v15 = vld [vmem:[#allocation2 + $0x2b8] sm:$0xff]  ;;  %p2260_p8 = scmp.ne.s32.totalorder %s1527_s13, %s2259_s8  ;;  %p2265_p10 = scmp.lt.s32.totalorder %s2259_s8, %s2259_s8 }
  0x84   :  { %315 = vmatpush1.msra.mxu0 %v298_v5  ;;  %v293_v13 = vld [vmem:[#allocation2 + $0x2e8] sm:$0xff]  ;;  %386 = vmatpush1.msra.mxu1 %v300_v10  ;;  %v278_v16 = vld [vmem:[#allocation2 + $0x270] sm:$0xff]  ;;  %v280_v19 = vld [vmem:[#allocation2 + $0x280] sm:$0xff] }
  0x85   :  { %316 = vmatprep.subr.mxu0 %v292_v7  ;;  %387 = vmatprep.subr.mxu1 %v294_v11  ;;  %v286_v17 = vld [vmem:[#allocation2 + $0x2b0] sm:$0xff]  ;;  %v277_v18 = vld [vmem:[#allocation2 + $0x268] sm:$0xff]  ;;  %v271_v20 = vld [vmem:[#allocation2 + $0x238] sm:$0xff]  ;;  %p2266_p11 = por %p2265_p10, %p2264_p9 }
  0x86   :  { %317 = vmatpush1.msra.mxu0 %v291_v9  ;;  %388 = vmatpush1.msra.mxu1 %v293_v13  ;;  %v279_v21 = vld [vmem:[#allocation2 + $0x278] sm:$0xff]  ;;  %v270_v22 = vld [vmem:[#allocation2 + $0x230] sm:$0xff]  ;;  %v273_v23 = vld [vmem:[#allocation2 + $0x248] sm:$0xff] }
  0x87   :  { %318 = vmatprep.subr.mxu0 %v285_v12  ;;  %389 = vmatprep.subr.mxu1 %v287_v15  ;;  %v264_v24 = vld [vmem:[#allocation2 + $0x200] sm:$0xff]  ;;  %v263_v26 = vld [vmem:[#allocation2 + $0x1f8] sm:$0xff]  ;;  %v266_v27 = vld [vmem:[#allocation2 + $0x210] sm:$0xff]  ;;  %p2267_p12 = pnand %p2266_p11, %p2260_p8 }
  0x88   :  { %319 = vmatpush1.msra.mxu0 %v284_v14  ;;  %390 = vmatpush1.msra.mxu1 %v286_v17  ;;  %v272_v25 = vld [vmem:[#allocation2 + $0x240] sm:$0xff]  ;;  %v257_v28 = vld [vmem:[#allocation2 + $0x1c8] sm:$0xff]  ;;  %v259_v31 = vld [vmem:[#allocation2 + $0x1d8] sm:$0xff] }
  0x89   :  { %320 = vmatprep.subr.mxu0 %v278_v16  ;;  %391 = vmatprep.subr.mxu1 %v280_v19  ;;  %v265_v29 = vld [vmem:[#allocation2 + $0x208] sm:$0xff]  ;;  %v256_v30 = vld [vmem:[#allocation2 + $0x1c0] sm:$0xff]  ;;  %v250_v32 = vld [vmem:[#allocation2 + $0x190] sm:$0xff] }
  0x8a   :  { %321 = vmatpush1.msra.mxu0 %v277_v18  ;;  %392 = vmatpush1.msra.mxu1 %v279_v21  ;;  %v258_v33 = vld [vmem:[#allocation2 + $0x1d0] sm:$0xff]  ;;  %v249_v34 = vld [vmem:[#allocation2 + $0x188] sm:$0xff]  ;;  %v252_v35 = vld [vmem:[#allocation2 + $0x1a0] sm:$0xff] }
  0x8b   :  { %322 = vmatprep.subr.mxu0 %v271_v20  ;;  %393 = vmatprep.subr.mxu1 %v273_v23  ;;  %v243_v36 = vld [vmem:[#allocation2 + $0x158] sm:$0xff]  ;;  %v242_v38 = vld [vmem:[#allocation2 + $0x150] sm:$0xff]  ;;  %v245_v39 = vld [vmem:[#allocation2 + $0x168] sm:$0xff] }
  0x8c   :  { %323 = vmatpush1.msra.mxu0 %v270_v22  ;;  %394 = vmatpush1.msra.mxu1 %v272_v25  ;;  %v251_v37 = vld [vmem:[#allocation2 + $0x198] sm:$0xff]  ;;  %v236_v40 = vld [vmem:[#allocation2 + $0x120] sm:$0xff]  ;;  %v238_v43 = vld [vmem:[#allocation2 + $0x130] sm:$0xff] }
  0x8d   :  { %324 = vmatprep.subr.mxu0 %v264_v24  ;;  %395 = vmatprep.subr.mxu1 %v266_v27  ;;  %v244_v41 = vld [vmem:[#allocation2 + $0x160] sm:$0xff]  ;;  %v235_v42 = vld [vmem:[#allocation2 + $0x118] sm:$0xff]  ;;  %v229_v44 = vld [vmem:[#allocation2 + $0xe8] sm:$0xff] }
  0x8e   :  { %325 = vmatpush1.msra.mxu0 %v263_v26  ;;  %396 = vmatpush1.msra.mxu1 %v265_v29  ;;  %v237_v45 = vld [vmem:[#allocation2 + $0x128] sm:$0xff]  ;;  %v228_v46 = vld [vmem:[#allocation2 + $0xe0] sm:$0xff]  ;;  %v231_v47 = vld [vmem:[#allocation2 + $0xf8] sm:$0xff] }
  0x8f   :  { %326 = vmatprep.subr.mxu0 %v257_v28  ;;  %397 = vmatprep.subr.mxu1 %v259_v31  ;;  %v222_v48 = vld [vmem:[#allocation2 + $0xb0] sm:$0xff]  ;;  %v221_v50 = vld [vmem:[#allocation2 + $0xa8] sm:$0xff]  ;;  %v224_v51 = vld [vmem:[#allocation2 + $0xc0] sm:$0xff] }
  0x90   :  { %327 = vmatpush1.msra.mxu0 %v256_v30  ;;  %398 = vmatpush1.msra.mxu1 %v258_v33  ;;  %v230_v49 = vld [vmem:[#allocation2 + $0xf0] sm:$0xff]  ;;  %v215_v52 = vld [vmem:[#allocation2 + $0x78] sm:$0xff]  ;;  %v217_v55 = vld [vmem:[#allocation2 + $0x88] sm:$0xff] }
  0x91   :  { %328 = vmatprep.subr.mxu0 %v250_v32  ;;  %399 = vmatprep.subr.mxu1 %v252_v35  ;;  %v223_v53 = vld [vmem:[#allocation2 + $0xb8] sm:$0xff]  ;;  %v214_v54 = vld [vmem:[#allocation2 + $0x70] sm:$0xff]  ;;  %v208_v56 = vld [vmem:[#allocation2 + $0x40] sm:$0xff] }
  0x92   :  { %329 = vmatpush1.msra.mxu0 %v249_v34  ;;  %400 = vmatpush1.msra.mxu1 %v251_v37  ;;  %v216_v57 = vld [vmem:[#allocation2 + $0x80] sm:$0xff]  ;;  %v207_v58 = vld [vmem:[#allocation2 + $0x38] sm:$0xff]  ;;  %v210_v59 = vld [vmem:[#allocation2 + $0x50] sm:$0xff] }
  0x93   :  { %330 = vmatprep.subr.mxu0 %v243_v36  ;;  %401 = vmatprep.subr.mxu1 %v245_v39  ;;  %v201_v60 = vld [vmem:[#allocation2 + $0x8] sm:$0xff]  ;;  %v200_v62 = vld [vmem:[#allocation2] sm:$0xff]  ;;  %v203_v63 = vld [vmem:[#allocation2 + $0x18] sm:$0xff] }
  0x94   :  { %331 = vmatpush1.msra.mxu0 %v242_v38  ;;  %402 = vmatpush1.msra.mxu1 %v244_v41  ;;  %v209_v61 = vld [vmem:[#allocation2 + $0x48] sm:$0xff]  ;;  %v2471_v1 = vld [vmem:[%s2712_s21] sm:$0xff]  ;;  %v202_v2 = vld [vmem:[#allocation2 + $0x10] sm:$0xff] }
  0x95   :  { %332 = vmatprep.subr.mxu0 %v236_v40  ;;  %403 = vmatprep.subr.mxu1 %v238_v43  ;;  %v310_v3 = vld [vmem:[#allocation2 + $0x370] sm:$0xff]  ;;  %v309_v4 = vld [vmem:[#allocation2 + $0x368] sm:$0xff]  ;;  %v303_v5 = vld [vmem:[#allocation2 + $0x338] sm:$0xff] }
  0x96   :  { %333 = vmatpush1.msra.mxu0 %v235_v42  ;;  %404 = vmatpush1.msra.mxu1 %v237_v45  ;;  %v302_v6 = vld [vmem:[#allocation2 + $0x330] sm:$0xff]  ;;  %v311_v7 = vld [vmem:[#allocation2 + $0x378] sm:$0xff]  ;;  %v296_v8 = vld [vmem:[#allocation2 + $0x300] sm:$0xff] }
  0x97   :  { %334 = vmatprep.subr.mxu0 %v229_v44  ;;  %405 = vmatprep.subr.mxu1 %v231_v47  ;;  %v295_v9 = vld [vmem:[#allocation2 + $0x2f8] sm:$0xff]  ;;  %v304_v10 = vld [vmem:[#allocation2 + $0x340] sm:$0xff]  ;;  %v289_v11 = vld [vmem:[#allocation2 + $0x2c8] sm:$0xff] }
  0x98   :  { %335 = vmatpush1.msra.mxu0 %v228_v46  ;;  %406 = vmatpush1.msra.mxu1 %v230_v49  ;;  %v288_v12 = vld [vmem:[#allocation2 + $0x2c0] sm:$0xff]  ;;  %v297_v13 = vld [vmem:[#allocation2 + $0x308] sm:$0xff]  ;;  %v282_v14 = vld [vmem:[#allocation2 + $0x290] sm:$0xff] }
  0x99   :  { %336 = vmatprep.subr.mxu0 %v222_v48  ;;  %407 = vmatprep.subr.mxu1 %v224_v51  ;;  %v281_v15 = vld [vmem:[#allocation2 + $0x288] sm:$0xff]  ;;  %v275_v16 = vld [vmem:[#allocation2 + $0x258] sm:$0xff]  ;;  %v274_v17 = vld [vmem:[#allocation2 + $0x250] sm:$0xff] }
  0x9a   :  { %337 = vmatpush1.msra.mxu0 %v221_v50  ;;  %408 = vmatpush1.msra.mxu1 %v223_v53  ;;  %v268_v18 = vld [vmem:[#allocation2 + $0x220] sm:$0xff]  ;;  %v267_v19 = vld [vmem:[#allocation2 + $0x218] sm:$0xff]  ;;  %v261_v20 = vld [vmem:[#allocation2 + $0x1e8] sm:$0xff] }
  0x9b   :  { %338 = vmatprep.subr.mxu0 %v215_v52  ;;  %409 = vmatprep.subr.mxu1 %v217_v55  ;;  %v260_v21 = vld [vmem:[#allocation2 + $0x1e0] sm:$0xff]  ;;  %v254_v22 = vld [vmem:[#allocation2 + $0x1b0] sm:$0xff]  ;;  %v253_v23 = vld [vmem:[#allocation2 + $0x1a8] sm:$0xff] }
  0x9c   :  { %339 = vmatpush1.msra.mxu0 %v214_v54  ;;  %410 = vmatpush1.msra.mxu1 %v216_v57  ;;  %v247_v24 = vld [vmem:[#allocation2 + $0x178] sm:$0xff]  ;;  %v246_v25 = vld [vmem:[#allocation2 + $0x170] sm:$0xff]  ;;  %v240_v26 = vld [vmem:[#allocation2 + $0x140] sm:$0xff] }
  0x9d   :  { %340 = vmatprep.subr.mxu0 %v208_v56  ;;  %411 = vmatprep.subr.mxu1 %v210_v59  ;;  %v239_v27 = vld [vmem:[#allocation2 + $0x138] sm:$0xff]  ;;  %v233_v28 = vld [vmem:[#allocation2 + $0x108] sm:$0xff]  ;;  %v232_v29 = vld [vmem:[#allocation2 + $0x100] sm:$0xff] }
  0x9e   :  { %341 = vmatpush1.msra.mxu0 %v207_v58  ;;  %412 = vmatpush1.msra.mxu1 %v209_v61  ;;  %v226_v30 = vld [vmem:[#allocation2 + $0xd0] sm:$0xff]  ;;  %v225_v31 = vld [vmem:[#allocation2 + $0xc8] sm:$0xff]  ;;  %v219_v32 = vld [vmem:[#allocation2 + $0x98] sm:$0xff] }
  0x9f   :  { %342 = vmatprep.subr.mxu0 %v201_v60  ;;  %413 = vmatprep.subr.mxu1 %v203_v63  ;;  %v218_v33 = vld [vmem:[#allocation2 + $0x90] sm:$0xff]  ;;  %v212_v34 = vld [vmem:[#allocation2 + $0x60] sm:$0xff]  ;;  %v211_v35 = vld [vmem:[#allocation2 + $0x58] sm:$0xff] }
  0xa0   :  { %343 = vmatpush1.msra.mxu0 %v200_v62  ;;  %414 = vmatpush1.msra.mxu1 %v202_v2  ;;  %v205_v36 = vld [vmem:[#allocation2 + $0x28] sm:$0xff]  ;;  %v204_v37 = vld [vmem:[#allocation2 + $0x20] sm:$0xff]  ;;  %v622_v38 = vld [vmem:[#allocation5 + $0x78] sm:$0xff] }
  0xa1   :  { %377 = vmatmul.mubr.f32.vlgmr.msra.gmra.mxu0 %v2471_v1  ;;  %448 = vmatmul.mubr.f32.vlgmr.msra.gmra.mxu1 %v2471_v1  ;;  %v621_v39 = vld [vmem:[#allocation5 + $0x70] sm:$0xff]  ;;  %v620_v41 = vld [vmem:[#allocation5 + $0x68] sm:$0xff]  ;;  %v283_v42 = vld [vmem:[#allocation2 + $0x298] sm:$0xff] }
  0xa2   :  { %454 = vmatprep.subr.mxu0 %v310_v3  ;;  %518 = vmatprep.mubr.f32.mxu0 %v2309_v0  ;;  %v290_v40 = vld [vmem:[#allocation2 + $0x2d0] sm:$0xff]  ;;  %v619_v43 = vld [vmem:[#allocation5 + $0x60] sm:$0xff]  ;;  %v618_v45 = vld [vmem:[#allocation5 + $0x58] sm:$0xff] }
  0xa3   :  { %455 = vmatpush1.msra.mxu0 %v309_v4  ;;  %1703 = vmatprep.subr.mxu1 %v2309_v0  ;;  %v276_v44 = vld [vmem:[#allocation2 + $0x260] sm:$0xff]  ;;  %v269_v46 = vld [vmem:[#allocation2 + $0x228] sm:$0xff]  ;;  %v617_v47 = vld [vmem:[#allocation5 + $0x50] sm:$0xff] }
  0xa4   :  { %456 = vmatprep.subr.mxu0 %v303_v5  ;;  %1704 = vmatpush3.msra.mxu1 %v311_v7  ;;  %v262_v48 = vld [vmem:[#allocation2 + $0x1f0] sm:$0xff]  ;;  %v616_v49 = vld [vmem:[#allocation5 + $0x48] sm:$0xff]  ;;  %v255_v50 = vld [vmem:[#allocation2 + $0x1b8] sm:$0xff] }
  0xa5   :  { %457 = vmatpush1.msra.mxu0 %v302_v6  ;;  %1705 = vmatprep.subr.mxu1 %v2309_v0  ;;  %v615_v51 = vld [vmem:[#allocation5 + $0x40] sm:$0xff]  ;;  %v614_v53 = vld [vmem:[#allocation5 + $0x38] sm:$0xff]  ;;  %v241_v54 = vld [vmem:[#allocation2 + $0x148] sm:$0xff] }
  0xa6   :  { %458 = vmatprep.subr.mxu0 %v296_v8  ;;  %1706 = vmatpush3.msra.mxu1 %v304_v10  ;;  %v248_v52 = vld [vmem:[#allocation2 + $0x180] sm:$0xff]  ;;  %v613_v55 = vld [vmem:[#allocation5 + $0x30] sm:$0xff]  ;;  %v612_v57 = vld [vmem:[#allocation5 + $0x28] sm:$0xff] }
  0xa7   :  { %459 = vmatpush1.msra.mxu0 %v295_v9  ;;  %1707 = vmatprep.subr.mxu1 %v2309_v0  ;;  %v234_v56 = vld [vmem:[#allocation2 + $0x110] sm:$0xff]  ;;  %v227_v58 = vld [vmem:[#allocation2 + $0xd8] sm:$0xff]  ;;  %v611_v59 = vld [vmem:[#allocation5 + $0x20] sm:$0xff] }
  0xa8   :  { %460 = vmatprep.subr.mxu0 %v289_v11  ;;  %1708 = vmatpush3.msra.mxu1 %v297_v13  ;;  %v220_v60 = vld [vmem:[#allocation2 + $0xa0] sm:$0xff]  ;;  %v610_v61 = vld [vmem:[#allocation5 + $0x18] sm:$0xff]  ;;  %v213_v62 = vld [vmem:[#allocation2 + $0x68] sm:$0xff] }
  0xa9   :  { %461 = vmatpush1.msra.mxu0 %v288_v12  ;;  %1709 = vmatprep.subr.mxu1 %v2309_v0  ;;  %v609_v63 = vld [vmem:[#allocation5 + $0x10] sm:$0xff]  ;;  %v608_v3 = vld [vmem:[#allocation5 + $0x8] sm:$0xff]  ;;  %v607_v4 = vld [vmem:[#allocation5] sm:$0xff] }
  0xaa   :  { %462 = vmatprep.subr.mxu0 %v282_v14  ;;  %1710 = vmatpush3.msra.mxu1 %v290_v40  ;;  %v206_v2 = vld [vmem:[#allocation2 + $0x30] sm:$0xff]  ;;  %v724_v40 = vld [vmem:[#allocation7 + $0x58] sm:$0xff] }
  0xab   :  { %463 = vmatpush1.msra.mxu0 %v281_v15  ;;  %1711 = vmatprep.subr.mxu1 %v2309_v0 }
  0xac   :  { %464 = vmatprep.subr.mxu0 %v275_v16  ;;  %1712 = vmatpush3.msra.mxu1 %v283_v42  ;;  %v722_v42 = vld [vmem:[#allocation7 + $0x48] sm:$0xff] }
  0xad   :  { %465 = vmatpush1.msra.mxu0 %v274_v17  ;;  %1713 = vmatprep.subr.mxu1 %v2309_v0 }
  0xae   :  { %466 = vmatprep.subr.mxu0 %v268_v18  ;;  %1714 = vmatpush3.msra.mxu1 %v276_v44  ;;  %v720_v44 = vld [vmem:[#allocation7 + $0x38] sm:$0xff] }
  0xaf   :  { %467 = vmatpush1.msra.mxu0 %v267_v19  ;;  %1715 = vmatprep.subr.mxu1 %v2309_v0 }
  0xb0   :  { %468 = vmatprep.subr.mxu0 %v261_v20  ;;  %1716 = vmatpush3.msra.mxu1 %v269_v46  ;;  %v744_v20 = vld [vmem:[#allocation7 + $0xf8] sm:$0xff]  ;;  %v718_v46 = vld [vmem:[#allocation7 + $0x28] sm:$0xff] }
  0xb1   :  { %469 = vmatpush1.msra.mxu0 %v260_v21  ;;  %1717 = vmatprep.subr.mxu1 %v2309_v0  ;;  %v743_v21 = vld [vmem:[#allocation7 + $0xf0] sm:$0xff] }
  0xb2   :  { %470 = vmatprep.subr.mxu0 %v254_v22  ;;  %1718 = vmatpush3.msra.mxu1 %v262_v48  ;;  %v742_v22 = vld [vmem:[#allocation7 + $0xe8] sm:$0xff]  ;;  %v716_v48 = vld [vmem:[#allocation7 + $0x18] sm:$0xff] }
  0xb3   :  { %471 = vmatpush1.msra.mxu0 %v253_v23  ;;  %1719 = vmatprep.subr.mxu1 %v2309_v0  ;;  %v741_v23 = vld [vmem:[#allocation7 + $0xe0] sm:$0xff] }
  0xb4   :  { %472 = vmatprep.subr.mxu0 %v247_v24  ;;  %1720 = vmatpush3.msra.mxu1 %v255_v50  ;;  %v740_v24 = vld [vmem:[#allocation7 + $0xd8] sm:$0xff]  ;;  %v714_v50 = vld [vmem:[#allocation7 + $0x8] sm:$0xff] }
  0xb5   :  { %473 = vmatpush1.msra.mxu0 %v246_v25  ;;  %1721 = vmatprep.subr.mxu1 %v2309_v0  ;;  %v739_v25 = vld [vmem:[#allocation7 + $0xd0] sm:$0xff] }
  0xb6   :  { %474 = vmatprep.subr.mxu0 %v240_v26  ;;  %1722 = vmatpush3.msra.mxu1 %v248_v52  ;;  %v738_v26 = vld [vmem:[#allocation7 + $0xc8] sm:$0xff]  ;;  %v861_v52 = vld [vmem:[#allocation8 + $0x78] sm:$0xff] }
  0xb7   :  { %475 = vmatpush1.msra.mxu0 %v239_v27  ;;  %1723 = vmatprep.subr.mxu1 %v2309_v0  ;;  %v737_v27 = vld [vmem:[#allocation7 + $0xc0] sm:$0xff] }
  0xb8   :  { %476 = vmatprep.subr.mxu0 %v233_v28  ;;  %1724 = vmatpush3.msra.mxu1 %v241_v54  ;;  %v736_v28 = vld [vmem:[#allocation7 + $0xb8] sm:$0xff]  ;;  %v859_v54 = vld [vmem:[#allocation8 + $0x68] sm:$0xff] }
  0xb9   :  { %477 = vmatpush1.msra.mxu0 %v232_v29  ;;  %1725 = vmatprep.subr.mxu1 %v2309_v0  ;;  %v735_v29 = vld [vmem:[#allocation7 + $0xb0] sm:$0xff] }
  0xba   :  { %478 = vmatprep.subr.mxu0 %v226_v30  ;;  %1726 = vmatpush3.msra.mxu1 %v234_v56  ;;  %v734_v30 = vld [vmem:[#allocation7 + $0xa8] sm:$0xff]  ;;  %v857_v56 = vld [vmem:[#allocation8 + $0x58] sm:$0xff] }
  0xbb   :  { %479 = vmatpush1.msra.mxu0 %v225_v31  ;;  %1727 = vmatprep.subr.mxu1 %v2309_v0  ;;  %v733_v31 = vld [vmem:[#allocation7 + $0xa0] sm:$0xff] }
  0xbc   :  { %480 = vmatprep.subr.mxu0 %v219_v32  ;;  %1728 = vmatpush3.msra.mxu1 %v227_v58  ;;  %v732_v32 = vld [vmem:[#allocation7 + $0x98] sm:$0xff]  ;;  %v855_v58 = vld [vmem:[#allocation8 + $0x48] sm:$0xff] }
  0xbd   :  { %481 = vmatpush1.msra.mxu0 %v218_v33  ;;  %1729 = vmatprep.subr.mxu1 %v2309_v0  ;;  %v731_v33 = vld [vmem:[#allocation7 + $0x90] sm:$0xff] }
  0xbe   :  { %482 = vmatprep.subr.mxu0 %v212_v34  ;;  %1730 = vmatpush3.msra.mxu1 %v220_v60  ;;  %v730_v34 = vld [vmem:[#allocation7 + $0x88] sm:$0xff]  ;;  %v853_v60 = vld [vmem:[#allocation8 + $0x38] sm:$0xff] }
  0xbf   :  { %483 = vmatpush1.msra.mxu0 %v211_v35  ;;  %1731 = vmatprep.subr.mxu1 %v2309_v0  ;;  %v729_v35 = vld [vmem:[#allocation7 + $0x80] sm:$0xff] }
  0xc0   :  { %484 = vmatprep.subr.mxu0 %v205_v36  ;;  %1732 = vmatpush3.msra.mxu1 %v213_v62  ;;  %v728_v36 = vld [vmem:[#allocation7 + $0x78] sm:$0xff]  ;;  %v851_v62 = vld [vmem:[#allocation8 + $0x28] sm:$0xff] }
  0xc1   :  { %485 = vmatpush1.msra.mxu0 %v204_v37  ;;  %1733 = vmatprep.subr.mxu1 %v2309_v0  ;;  %v727_v37 = vld [vmem:[#allocation7 + $0x70] sm:$0xff] }
  0xc2   :  { %519 = vmatmul.mubr.f32.vlgmr.msra.gmra.mxu0 %v2471_v1  ;;  %1738 = vmatprep.subr.mxu0 %v2309_v0 }
  0xc3   :  { %1739 = vmatpush3.msra.mxu0 %v622_v38  ;;  %1734 = vmatpush3.msra.mxu1 %v206_v2  ;;  %v726_v38 = vld [vmem:[#allocation7 + $0x68] sm:$0xff] }
  0xc4   :  { %1740 = vmatprep.subr.mxu0 %v2309_v0  ;;  %1735 = vmatprep.mubr.msk.f32.mxu1 %vm2310_vm0, %v2309_v0 }
  0xc5   :  { %1741 = vmatpush3.msra.mxu0 %v621_v39  ;;  %1736 = vmatmul.mubr.f32.vlgmr.msra.gmra.mxu1 %v2471_v1  ;;  %v725_v39 = vld [vmem:[#allocation7 + $0x60] sm:$0xff] }
  0xc6   :  { %1742 = vmatprep.subr.mxu0 %v2309_v0  ;;  %1770 = vmatprep.mubr.msk.f32.mxu0 %vm2310_vm0, %v2309_v0 }
  0xc7   :  { %1743 = vmatpush3.msra.mxu0 %v620_v41  ;;  %809 = vmatprep.mubr.f32.mxu1 %v2309_v0  ;;  %v723_v41 = vld [vmem:[#allocation7 + $0x50] sm:$0xff] }
  0xc8   :  { %1744 = vmatprep.subr.mxu0 %v2309_v0  ;;  %745 = vmatprep.subr.mxu1 %v744_v20  ;;  %v847_v20 = vld [vmem:[#allocation8 + $0x8] sm:$0xff] }
  0xc9   :  { %1745 = vmatpush3.msra.mxu0 %v619_v43  ;;  %746 = vmatpush1.msra.mxu1 %v743_v21  ;;  %v721_v43 = vld [vmem:[#allocation7 + $0x40] sm:$0xff] }
  0xca   :  { %1746 = vmatprep.subr.mxu0 %v2309_v0  ;;  %747 = vmatprep.subr.mxu1 %v742_v22  ;;  %v846_v21 = vld [vmem:[#allocation8] sm:$0xff] }
  0xcb   :  { %1747 = vmatpush3.msra.mxu0 %v618_v45  ;;  %748 = vmatpush1.msra.mxu1 %v741_v23  ;;  %v719_v45 = vld [vmem:[#allocation7 + $0x30] sm:$0xff]  ;;  %v1541_v22 = vld [vmem:[%s2691_s5] ss:$0 sm:$0xff] }
  0xcc   :  { %1748 = vmatprep.subr.mxu0 %v2309_v0  ;;  %749 = vmatprep.subr.mxu1 %v740_v24  ;;  %v1542_v24 = vld [vmem:[%s2692_s6] ss:$0 sm:$0xff] }
  0xcd   :  { %1749 = vmatpush3.msra.mxu0 %v617_v47  ;;  %750 = vmatpush1.msra.mxu1 %v739_v25  ;;  %v717_v47 = vld [vmem:[#allocation7 + $0x20] sm:$0xff] }
  0xce   :  { %1750 = vmatprep.subr.mxu0 %v2309_v0  ;;  %751 = vmatprep.subr.mxu1 %v738_v26 }
  0xcf   :  { %1751 = vmatpush3.msra.mxu0 %v616_v49  ;;  %752 = vmatpush1.msra.mxu1 %v737_v27  ;;  %v715_v49 = vld [vmem:[#allocation7 + $0x10] sm:$0xff] }
  0xd0   :  { %1752 = vmatprep.subr.mxu0 %v2309_v0  ;;  %753 = vmatprep.subr.mxu1 %v736_v28 }
  0xd1   :  { %1753 = vmatpush3.msra.mxu0 %v615_v51  ;;  %754 = vmatpush1.msra.mxu1 %v735_v29  ;;  %v713_v51 = vld [vmem:[#allocation7] sm:$0xff] }
  0xd2   :  { %1754 = vmatprep.subr.mxu0 %v2309_v0  ;;  %755 = vmatprep.subr.mxu1 %v734_v30 }
  0xd3   :  { %1755 = vmatpush3.msra.mxu0 %v614_v53  ;;  %756 = vmatpush1.msra.mxu1 %v733_v31  ;;  %v860_v53 = vld [vmem:[#allocation8 + $0x70] sm:$0xff]  ;;  %v969_v31 = vld [vmem:[#allocation10 + $0x78] sm:$0xff] }
  0xd4   :  { %1756 = vmatprep.subr.mxu0 %v2309_v0  ;;  %757 = vmatprep.subr.mxu1 %v732_v32 }
  0xd5   :  { %1757 = vmatpush3.msra.mxu0 %v613_v55  ;;  %758 = vmatpush1.msra.mxu1 %v731_v33  ;;  %v858_v55 = vld [vmem:[#allocation8 + $0x60] sm:$0xff]  ;;  %v968_v33 = vld [vmem:[#allocation10 + $0x70] sm:$0xff] }
  0xd6   :  { %1758 = vmatprep.subr.mxu0 %v2309_v0  ;;  %759 = vmatprep.subr.mxu1 %v730_v34 }
  0xd7   :  { %1759 = vmatpush3.msra.mxu0 %v612_v57  ;;  %760 = vmatpush1.msra.mxu1 %v729_v35  ;;  %v856_v57 = vld [vmem:[#allocation8 + $0x50] sm:$0xff]  ;;  %v967_v35 = vld [vmem:[#allocation10 + $0x68] sm:$0xff] }
  0xd8   :  { %1760 = vmatprep.subr.mxu0 %v2309_v0  ;;  %761 = vmatprep.subr.mxu1 %v728_v36  ;;  %v966_v36 = vld [vmem:[#allocation10 + $0x60] sm:$0xff] }
  0xd9   :  { %1761 = vmatpush3.msra.mxu0 %v611_v59  ;;  %762 = vmatpush1.msra.mxu1 %v727_v37  ;;  %v854_v59 = vld [vmem:[#allocation8 + $0x40] sm:$0xff]  ;;  %v965_v37 = vld [vmem:[#allocation10 + $0x58] sm:$0xff] }
  0xda   :  { %1762 = vmatprep.subr.mxu0 %v2309_v0  ;;  %763 = vmatprep.subr.mxu1 %v726_v38  ;;  %v964_v38 = vld [vmem:[#allocation10 + $0x50] sm:$0xff] }
  0xdb   :  { %1763 = vmatpush3.msra.mxu0 %v610_v61  ;;  %764 = vmatpush1.msra.mxu1 %v725_v39  ;;  %v852_v61 = vld [vmem:[#allocation8 + $0x30] sm:$0xff]  ;;  %v963_v39 = vld [vmem:[#allocation10 + $0x48] sm:$0xff] }
  0xdc   :  { %1764 = vmatprep.subr.mxu0 %v2309_v0  ;;  %765 = vmatprep.subr.mxu1 %v724_v40  ;;  %v962_v40 = vld [vmem:[#allocation10 + $0x40] sm:$0xff] }
  0xdd   :  { %1765 = vmatpush3.msra.mxu0 %v609_v63  ;;  %766 = vmatpush1.msra.mxu1 %v723_v41  ;;  %v850_v63 = vld [vmem:[#allocation8 + $0x20] sm:$0xff]  ;;  %v961_v41 = vld [vmem:[#allocation10 + $0x38] sm:$0xff] }
  0xde   :  { %1766 = vmatprep.subr.mxu0 %v2309_v0  ;;  %767 = vmatprep.subr.mxu1 %v722_v42 }
  0xdf   :  { %1767 = vmatpush3.msra.mxu0 %v608_v3  ;;  %768 = vmatpush1.msra.mxu1 %v721_v43 }
  0xe0   :  { %1768 = vmatprep.subr.mxu0 %v2309_v0  ;;  %769 = vmatprep.subr.mxu1 %v720_v44  ;;  %v960_v44 = vld [vmem:[#allocation10 + $0x30] sm:$0xff] }
  0xe1   :  { %1769 = vmatpush3.msra.mxu0 %v607_v4  ;;  %770 = vmatpush1.msra.mxu1 %v719_v45  ;;  %v959_v45 = vld [vmem:[#allocation10 + $0x28] sm:$0xff] }
  0xe2   :  { %1773 = vmatprep.subr.mxu0 %v2309_v0  ;;  %771 = vmatprep.subr.mxu1 %v718_v46  ;;  %v958_v46 = vld [vmem:[#allocation10 + $0x20] sm:$0xff] }
  0xe3   :  { %772 = vmatpush1.msra.mxu1 %v717_v47  ;;  %v957_v47 = vld [vmem:[#allocation10 + $0x18] sm:$0xff] }
  0xe4   :  { %773 = vmatprep.subr.mxu1 %v716_v48  ;;  %v956_v48 = vld [vmem:[#allocation10 + $0x10] sm:$0xff] }
  0xe5   :  { %774 = vmatpush1.msra.mxu1 %v715_v49  ;;  %v955_v49 = vld [vmem:[#allocation10 + $0x8] sm:$0xff] }
  0xe6   :  { %775 = vmatprep.subr.mxu1 %v714_v50  ;;  %v954_v50 = vld [vmem:[#allocation10] sm:$0xff] }
  0xe7   :  { %776 = vmatpush1.msra.mxu1 %v713_v51 }
  0xe8   :  { %1814 = vmatprep.subr.mxu1 %v2309_v0 }
 0x161   :  { %v378_v5 = vpop.f32.mrf.mxu0  ;;  %v449_v7 = vpop.f32.mrf.mxu1 }
 0x162   :  { %v595_v8 = vmul.f32 %v378_v5, %v378_v5  ;;  %v598_v10 = vmul.f32 %v449_v7, %v449_v7  ;;  %v1540_v5 = vld [vmem:[%s2713_s9] ss:$0 sm:$0xff] }
 0x163   :  { %v380_v6 = vpop.f32.mrf.mxu0  ;;  %v2518_v17 = vpop.f32.mrf.mxu1 }
 0x164   :  { %v596_v9 = vmul.f32 %v380_v6, %v380_v6 }
 0x166   :  { %v597_v11 = vadd.f32 %v596_v9, %v595_v8 }
 0x168   :  { %v599_v12 = vadd.f32 %v598_v10, %v597_v11 }
 0x16a   :  { %2043 = vrsqrt.f32 %v599_v12  ;;  %vm602_vm1 = vcmp.eq.f32.partialorder %v599_v12, inf  ;;  %v605_v14 = vand.u32 2147483648, %v599_v12  ;;  %vm604_vm2 = vcmp.eq.f32.partialorder %v599_v12, 0.0 }
 0x177   :  { %v2044_v1 = vpop.eup %2043 }
 0x178   :  { %v601_v13 = vmul.f32 %v2044_v1, %v599_v12 }
 0x17a   :  { %v603_v15 = vsel %vm602_vm1, %v599_v12, %v601_v13 }
 0x17b   :  { %v606_v16 = vsel %vm604_vm2, %v605_v14, %v603_v15 }
 0x17c   :  { %1771 = vmatmul.mubr.f32.vlgmr.msra.gmra.mxu0 %v606_v16 }
 0x17d   :  { %1805 = vmatprep.mubr.msk.f32.mxu0 %vm2310_vm0, %v2309_v0  ;;  %1774 = vmatpush3.msra.mxu0 %v861_v52 }
 0x17e   :  { %1775 = vmatprep.subr.mxu0 %v2309_v0 }
 0x17f   :  { %1776 = vmatpush3.msra.mxu0 %v860_v53 }
 0x180   :  { %1777 = vmatprep.subr.mxu0 %v2309_v0 }
 0x181   :  { %1778 = vmatpush3.msra.mxu0 %v859_v54 }
 0x182   :  { %1779 = vmatprep.subr.mxu0 %v2309_v0  ;;  %v520_v2 = vpop.f32.mrf.mxu0 }
 0x183   :  { %1780 = vmatpush3.msra.mxu0 %v858_v55  ;;  %v985_v55 = vld [vmem:[#allocation11 + $0x78] sm:$0xff] }
 0x184   :  { %1781 = vmatprep.subr.mxu0 %v2309_v0  ;;  %v522_v3 = vpop.f32.mrf.mxu0 }
 0x185   :  { %v2520_v18 = vpop.f32.mrf.mxu1  ;;  %1782 = vmatpush3.msra.mxu0 %v857_v56  ;;  %v984_v56 = vld [vmem:[#allocation11 + $0x70] sm:$0xff] }
 0x186   :  { %1783 = vmatprep.subr.mxu0 %v2309_v0 }
 0x187   :  { %v1737_v19 = vpop.f32.mrf.mxu1  ;;  %1784 = vmatpush3.msra.mxu0 %v856_v57  ;;  %v983_v57 = vld [vmem:[#allocation11 + $0x68] sm:$0xff] }
 0x188   :  { %1785 = vmatprep.subr.mxu0 %v2309_v0  ;;  %v849_v19 = vld [vmem:[#allocation8 + $0x18] sm:$0xff] }
 0x189   :  { %1786 = vmatpush3.msra.mxu0 %v855_v58  ;;  %v982_v58 = vld [vmem:[#allocation11 + $0x60] sm:$0xff] }
 0x18a   :  { %1787 = vmatprep.subr.mxu0 %v2309_v0 }
 0x18b   :  { %1788 = vmatpush3.msra.mxu0 %v854_v59  ;;  %v981_v59 = vld [vmem:[#allocation11 + $0x58] sm:$0xff] }
 0x18c   :  { %1789 = vmatprep.subr.mxu0 %v2309_v0 }
 0x18d   :  { %1790 = vmatpush3.msra.mxu0 %v853_v60  ;;  %v980_v60 = vld [vmem:[#allocation11 + $0x50] sm:$0xff] }
 0x18e   :  { %1791 = vmatprep.subr.mxu0 %v2309_v0 }
 0x18f   :  { %1792 = vmatpush3.msra.mxu0 %v852_v61  ;;  %v979_v61 = vld [vmem:[#allocation11 + $0x48] sm:$0xff] }
 0x190   :  { %1793 = vmatprep.subr.mxu0 %v2309_v0 }
 0x191   :  { %1794 = vmatpush3.msra.mxu0 %v851_v62  ;;  %v978_v62 = vld [vmem:[#allocation11 + $0x40] sm:$0xff] }
 0x192   :  { %1795 = vmatprep.subr.mxu0 %v2309_v0 }
 0x193   :  { %1796 = vmatpush3.msra.mxu0 %v850_v63  ;;  %v977_v63 = vld [vmem:[#allocation11 + $0x38] sm:$0xff] }
 0x194   :  { %1797 = vmatprep.subr.mxu0 %v2309_v0 }
 0x195   :  { %1798 = vmatpush3.msra.mxu0 %v849_v19 }
 0x196   :  { %1799 = vmatprep.subr.mxu0 %v2309_v0 }
 0x23c   :  { %v689_v4 = vpop.f32.mrf.mxu0 }
 0x23d   :  { %v693_v6 = vadd.f32 %v689_v4, %v2520_v18  ;;  %v848_v18 = vld [vmem:[#allocation8 + $0x10] sm:$0xff]  ;;  %v974_v4 = vld [vmem:[#allocation11 + $0x20] sm:$0xff] }
 0x23e   :  { %v1772_v7 = vpop.f32.mrf.mxu0  ;;  %1800 = vmatpush3.msra.mxu0 %v848_v18 }
 0x23f   :  { %v701_v8 = vadd.f32 %v1540_v5, %v693_v6  ;;  %1801 = vmatprep.subr.mxu0 %v2309_v0  ;;  %v973_v5 = vld [vmem:[#allocation11 + $0x18] sm:$0xff]  ;;  %v972_v6 = vld [vmem:[#allocation11 + $0x10] sm:$0xff]  ;;  %v971_v7 = vld [vmem:[#allocation11 + $0x8] sm:$0xff] }
 0x240   :  { %1802 = vmatpush3.msra.mxu0 %v847_v20 }
 0x241   :  { %v702_v9 = vand.u32 2147483647, %v701_v8  ;;  %vm709_vm3 = vcmp.ge.f32.partialorder %v701_v8, 0.0  ;;  %1803 = vmatprep.subr.mxu0 %v2309_v0 }
 0x242   :  { %1804 = vmatpush3.msra.mxu0 %v846_v21 }
 0x243   :  { %v703_v10 = vsub.f32 0.0, %v702_v9  ;;  %1849 = vmatprep.subr.mxu0 %v2309_v0 }
 0x245   :  { %v704_v11 = vmul.f32 1.442695, %v703_v10 }
 0x247   :  { %2045 = vpow2.f32 %v704_v11 }
 0x254   :  { %v2046_v12 = vpop.eup %2045 }
 0x255   :  { %v706_v1 = vadd.f32 1.0, %v2046_v12 }
 0x257   :  { %2047 = vrcp.f32 %v706_v1 }
 0x264   :  { %v2048_v13 = vpop.eup %2047 }
 0x265   :  { %v710_v14 = vsub.f32 1.0, %v2048_v13 }
 0x267   :  { %v711_v15 = vsel %vm709_vm3, %v2048_v13, %v710_v14 }
 0x268   :  { %v712_v16 = vmul.f32 %v711_v15, %v701_v8  ;;  %v970_v8 = vld [vmem:[#allocation11] sm:$0xff] }
 0x26a   :  { %810 = vmatmul.mubr.f32.vlgmr.msra.gmra.mxu1 %v712_v16 }
 0x26b   :  { %1846 = vmatprep.mubr.msk.f32.mxu1 %vm2310_vm0, %v2309_v0  ;;  %1815 = vmatpush3.msra.mxu1 %v985_v55  ;;  %v1240_v55 = vld [vmem:[#allocation14 + $0x10] sm:$0xff] }
 0x26c   :  { %1816 = vmatprep.subr.mxu1 %v2309_v0 }
 0x26d   :  { %1817 = vmatpush3.msra.mxu1 %v984_v56 }
 0x26e   :  { %1818 = vmatprep.subr.mxu1 %v2309_v0 }
 0x26f   :  { %1819 = vmatpush3.msra.mxu1 %v983_v57  ;;  %v1543_v57 = vld [vmem:[%s2696_s10] ss:$0 sm:$0xff] }
 0x270   :  { %1820 = vmatprep.subr.mxu1 %v2309_v0 }
 0x271   :  { %1821 = vmatpush3.msra.mxu1 %v982_v58 }
 0x272   :  { %1822 = vmatprep.subr.mxu1 %v2309_v0 }
 0x273   :  { %1823 = vmatpush3.msra.mxu1 %v981_v59 }
 0x274   :  { %1824 = vmatprep.subr.mxu1 %v2309_v0 }
 0x275   :  { %1825 = vmatpush3.msra.mxu1 %v980_v60 }
 0x276   :  { %1826 = vmatprep.subr.mxu1 %v2309_v0 }
 0x277   :  { %1827 = vmatpush3.msra.mxu1 %v979_v61 }
 0x278   :  { %1828 = vmatprep.subr.mxu1 %v2309_v0 }
 0x279   :  { %1829 = vmatpush3.msra.mxu1 %v978_v62 }
 0x27a   :  { %1830 = vmatprep.subr.mxu1 %v2309_v0 }
 0x27b   :  { %1831 = vmatpush3.msra.mxu1 %v977_v63 }
 0x27c   :  { %1832 = vmatprep.subr.mxu1 %v2309_v0 }
 0x32a   :  { %v811_v23 = vpop.f32.mrf.mxu1 }
 0x32b   :  { %v2551_v25 = vadd.f32 %v1541_v22, %v811_v23 }
 0x32c   :  { %v813_v26 = vpop.f32.mrf.mxu1 }
 0x32d   :  { %v824_v27 = vand.u32 2147483647, %v2551_v25  ;;  %v842_v28 = vadd.f32 %v1542_v24, %v813_v26  ;;  %vm831_vm4 = vcmp.ge.f32.partialorder %v2551_v25, 0.0 }
 0x32f   :  { %v825_v29 = vsub.f32 0.0, %v824_v27  ;;  %v843_v30 = vmul.f32 %v842_v28, %v2518_v17  ;;  %v844_v34 = vmul.f32 %v842_v28, %v520_v2  ;;  %v845_v17 = vmul.f32 %v842_v28, %v522_v3  ;;  %v976_v2 = vld [vmem:[#allocation11 + $0x30] sm:$0xff]  ;;  %v975_v3 = vld [vmem:[#allocation11 + $0x28] sm:$0xff]  ;;  %v1160_v27 = vld [vmem:[#allocation13 + $0x78] sm:$0xff] }
 0x330   :  { %1833 = vmatpush3.msra.mxu1 %v976_v2  ;;  %v1159_v28 = vld [vmem:[#allocation13 + $0x70] sm:$0xff] }
 0x331   :  { %v826_v32 = vmul.f32 1.442695, %v825_v29  ;;  %1806 = vmatmul.mubr.f32.vlgmr.msra.gmra.mxu0 %v843_v30  ;;  %1834 = vmatprep.subr.mxu1 %v2309_v0  ;;  %v1158_v29 = vld [vmem:[#allocation13 + $0x68] sm:$0xff]  ;;  %v1157_v30 = vld [vmem:[#allocation13 + $0x60] sm:$0xff] }
 0x332   :  { %1808 = vmatprep.mubr.msk.f32.mxu0 %vm2310_vm0, %v2309_v0  ;;  %1850 = vmatpush3.msra.mxu0 %v969_v31  ;;  %v1156_v31 = vld [vmem:[#allocation13 + $0x58] sm:$0xff] }
 0x333   :  { %2049 = vpow2.f32 %v826_v32  ;;  %1851 = vmatprep.subr.mxu0 %v2309_v0  ;;  %1835 = vmatpush3.msra.mxu1 %v975_v3  ;;  %v1155_v32 = vld [vmem:[#allocation13 + $0x50] sm:$0xff] }
 0x334   :  { %1852 = vmatpush3.msra.mxu0 %v968_v33  ;;  %1836 = vmatprep.subr.mxu1 %v2309_v0  ;;  %v1154_v33 = vld [vmem:[#allocation13 + $0x48] sm:$0xff] }
 0x335   :  { %1809 = vmatmul.mubr.f32.gmra.mxu0 %v844_v34  ;;  %1853 = vmatprep.subr.mxu0 %v2309_v0  ;;  %v1153_v34 = vld [vmem:[#allocation13 + $0x40] sm:$0xff] }
 0x336   :  { %1811 = vmatprep.mubr.msk.f32.mxu0 %vm2310_vm0, %v2309_v0  ;;  %1854 = vmatpush3.msra.mxu0 %v967_v35  ;;  %v1152_v35 = vld [vmem:[#allocation13 + $0x38] sm:$0xff] }
 0x337   :  { %1855 = vmatprep.subr.mxu0 %v2309_v0  ;;  %1837 = vmatpush3.msra.mxu1 %v974_v4 }
 0x338   :  { %1856 = vmatpush3.msra.mxu0 %v966_v36  ;;  %1838 = vmatprep.subr.mxu1 %v2309_v0  ;;  %v1151_v36 = vld [vmem:[#allocation13 + $0x30] sm:$0xff] }
 0x339   :  { %1812 = vmatmul.mubr.f32.gmra.mxu0 %v845_v17  ;;  %1857 = vmatprep.subr.mxu0 %v2309_v0  ;;  %v1150_v17 = vld [vmem:[#allocation13 + $0x28] sm:$0xff] }
 0x33a   :  { %1858 = vmatpush3.msra.mxu0 %v965_v37  ;;  %1881 = vmatprep.mubr.msk.f32.mxu0 %vm2310_vm0, %v2309_v0  ;;  %v1149_v37 = vld [vmem:[#allocation13 + $0x20] sm:$0xff] }
 0x33b   :  { %1859 = vmatprep.subr.mxu0 %v2309_v0  ;;  %1839 = vmatpush3.msra.mxu1 %v973_v5 }
 0x33c   :  { %1860 = vmatpush3.msra.mxu0 %v964_v38  ;;  %1840 = vmatprep.subr.mxu1 %v2309_v0  ;;  %v1148_v38 = vld [vmem:[#allocation13 + $0x18] sm:$0xff] }
 0x33d   :  { %1861 = vmatprep.subr.mxu0 %v2309_v0  ;;  %1841 = vmatpush3.msra.mxu1 %v972_v6 }
 0x33e   :  { %1862 = vmatpush3.msra.mxu0 %v963_v39  ;;  %1842 = vmatprep.subr.mxu1 %v2309_v0  ;;  %v1147_v39 = vld [vmem:[#allocation13 + $0x10] sm:$0xff] }
 0x33f   :  { %1863 = vmatprep.subr.mxu0 %v2309_v0  ;;  %1843 = vmatpush3.msra.mxu1 %v971_v7 }
 0x340   :  { %v2050_v42 = vpop.eup %2049  ;;  %1864 = vmatpush3.msra.mxu0 %v962_v40  ;;  %1844 = vmatprep.subr.mxu1 %v2309_v0  ;;  %v1146_v40 = vld [vmem:[#allocation13 + $0x8] sm:$0xff] }
 0x341   :  { %v828_v43 = vadd.f32 1.0, %v2050_v42  ;;  %1865 = vmatprep.subr.mxu0 %v2309_v0  ;;  %1845 = vmatpush3.msra.mxu1 %v970_v8  ;;  %v1253_v42 = vld [vmem:[#allocation14 + $0x78] sm:$0xff]  ;;  %v1239_v8 = vld [vmem:[#allocation14 + $0x8] sm:$0xff] }
 0x342   :  { %1866 = vmatpush3.msra.mxu0 %v961_v41  ;;  %1884 = vmatprep.subr.mxu1 %v2309_v0  ;;  %v1145_v41 = vld [vmem:[#allocation13] sm:$0xff] }
 0x343   :  { %2051 = vrcp.f32 %v828_v43  ;;  %1867 = vmatprep.subr.mxu0 %v2309_v0  ;;  %v1252_v43 = vld [vmem:[#allocation14 + $0x70] sm:$0xff] }
 0x344   :  { %1868 = vmatpush3.msra.mxu0 %v960_v44  ;;  %v1251_v44 = vld [vmem:[#allocation14 + $0x68] sm:$0xff] }
 0x345   :  { %1869 = vmatprep.subr.mxu0 %v2309_v0 }
 0x346   :  { %1870 = vmatpush3.msra.mxu0 %v959_v45  ;;  %v1250_v45 = vld [vmem:[#allocation14 + $0x60] sm:$0xff] }
 0x347   :  { %1871 = vmatprep.subr.mxu0 %v2309_v0 }
 0x348   :  { %1872 = vmatpush3.msra.mxu0 %v958_v46  ;;  %v1249_v46 = vld [vmem:[#allocation14 + $0x58] sm:$0xff] }
 0x349   :  { %1873 = vmatprep.subr.mxu0 %v2309_v0 }
 0x34a   :  { %1874 = vmatpush3.msra.mxu0 %v957_v47  ;;  %v1248_v47 = vld [vmem:[#allocation14 + $0x50] sm:$0xff] }
 0x34b   :  { %1875 = vmatprep.subr.mxu0 %v2309_v0 }
 0x34c   :  { %1876 = vmatpush3.msra.mxu0 %v956_v48  ;;  %v1247_v48 = vld [vmem:[#allocation14 + $0x48] sm:$0xff] }
 0x34d   :  { %1877 = vmatprep.subr.mxu0 %v2309_v0 }
 0x34e   :  { %1878 = vmatpush3.msra.mxu0 %v955_v49  ;;  %v1246_v49 = vld [vmem:[#allocation14 + $0x40] sm:$0xff] }
 0x34f   :  { %1879 = vmatprep.subr.mxu0 %v2309_v0 }
 0x350   :  { %v2052_v51 = vpop.eup %2051  ;;  %1880 = vmatpush3.msra.mxu0 %v954_v50  ;;  %v1245_v50 = vld [vmem:[#allocation14 + $0x38] sm:$0xff] }
 0x351   :  { %v832_v52 = vsub.f32 1.0, %v2052_v51  ;;  %1919 = vmatprep.subr.mxu0 %v2309_v0 }
 0x353   :  { %v833_v53 = vsel %vm831_vm4, %v2052_v51, %v832_v52  ;;  %v1244_v51 = vld [vmem:[#allocation14 + $0x30] sm:$0xff]  ;;  %v1243_v52 = vld [vmem:[#allocation14 + $0x28] sm:$0xff] }
 0x354   :  { %v834_v54 = vmul.f32 %v833_v53, %v2551_v25  ;;  %v1242_v53 = vld [vmem:[#allocation14 + $0x20] sm:$0xff] }
 0x356   :  { %1882 = vmatmul.mubr.f32.vlgmr.msra.gmra.mxu0 %v834_v54  ;;  %v1241_v54 = vld [vmem:[#allocation14 + $0x18] sm:$0xff] }
 0x357   :  { %1951 = vmatprep.mubr.msk.f32.mxu0 %vm2310_vm0, %v2309_v0  ;;  %1920 = vmatpush3.msra.mxu0 %v1253_v42  ;;  %v1545_v42 = vld [vmem:[%s2700_s14] ss:$0 sm:$0xff] }
 0x358   :  { %1921 = vmatprep.subr.mxu0 %v2309_v0 }
 0x359   :  { %1922 = vmatpush3.msra.mxu0 %v1252_v43 }
 0x35a   :  { %1923 = vmatprep.subr.mxu0 %v2309_v0 }
 0x35b   :  { %1924 = vmatpush3.msra.mxu0 %v1251_v44 }
 0x35c   :  { %1925 = vmatprep.subr.mxu0 %v2309_v0 }
 0x35d   :  { %1926 = vmatpush3.msra.mxu0 %v1250_v45 }
 0x35e   :  { %1927 = vmatprep.subr.mxu0 %v2309_v0 }
 0x35f   :  { %1928 = vmatpush3.msra.mxu0 %v1249_v46 }
 0x360   :  { %1929 = vmatprep.subr.mxu0 %v2309_v0 }
 0x361   :  { %1930 = vmatpush3.msra.mxu0 %v1248_v47  ;;  %v1428_v47 = vld [vmem:[#allocation17 + $0x10] sm:$0xff] }
 0x362   :  { %1931 = vmatprep.subr.mxu0 %v2309_v0 }
 0x363   :  { %1932 = vmatpush3.msra.mxu0 %v1247_v48  ;;  %v1427_v48 = vld [vmem:[#allocation17 + $0x8] sm:$0xff] }
 0x364   :  { %1933 = vmatprep.subr.mxu0 %v2309_v0 }
 0x365   :  { %1934 = vmatpush3.msra.mxu0 %v1246_v49  ;;  %v1426_v49 = vld [vmem:[#allocation17] sm:$0xff] }
 0x366   :  { %1935 = vmatprep.subr.mxu0 %v2309_v0 }
 0x367   :  { %1936 = vmatpush3.msra.mxu0 %v1245_v50  ;;  %v1546_v50 = vld [vmem:[%s2702_s16] ss:$0 sm:$0xff] }
 0x368   :  { %1937 = vmatprep.subr.mxu0 %v2309_v0 }
 0x369   :  { %1938 = vmatpush3.msra.mxu0 %v1244_v51 }
 0x36a   :  { %1939 = vmatprep.subr.mxu0 %v2309_v0 }
 0x36b   :  { %1940 = vmatpush3.msra.mxu0 %v1243_v52 }
 0x36c   :  { %1941 = vmatprep.subr.mxu0 %v2309_v0 }
 0x36d   :  { %1942 = vmatpush3.msra.mxu0 %v1242_v53 }
 0x36e   :  { %1943 = vmatprep.subr.mxu0 %v2309_v0 }
 0x36f   :  { %1944 = vmatpush3.msra.mxu0 %v1241_v54 }
 0x370   :  { %1945 = vmatprep.subr.mxu0 %v2309_v0 }
 0x371   :  { %1946 = vmatpush3.msra.mxu0 %v1240_v55  ;;  %v1547_v55 = vld [vmem:[%s2704_s18] ss:$0 sm:$0xff] }
 0x372   :  { %1947 = vmatprep.subr.mxu0 %v2309_v0 }
 0x373   :  { %1948 = vmatpush3.msra.mxu0 %v1239_v8 }
 0x374   :  { %1949 = vmatprep.subr.mxu0 %v2309_v0 }
 0x3f1   :  { %v928_v9 = vpop.f32.mrf.mxu0 }
 0x3f2   :  { %v942_v13 = vmul.f32 %v928_v9, %v928_v9  ;;  %v1238_v9 = vld [vmem:[#allocation14] sm:$0xff] }
 0x3f3   :  { %v1807_v10 = vpop.f32.mrf.mxu0  ;;  %1950 = vmatpush3.msra.mxu0 %v1238_v9 }
 0x3f4   :  { %v1347_v10 = vld [vmem:[#allocation16 + $0x78] sm:$0xff]  ;;  %1989 = vmatprep.subr.mxu0 %v2309_v0 }
 0x3f5   :  { %v933_v11 = vpop.f32.mrf.mxu0 }
 0x3f6   :  { %v943_v12 = vmul.f32 %v933_v11, %v933_v11  ;;  %v1346_v11 = vld [vmem:[#allocation16 + $0x70] sm:$0xff] }
 0x3f7   :  { %v1810_v1 = vpop.f32.mrf.mxu0 }
 0x3f8   :  { %v944_v15 = vadd.f32 %v943_v12, %v942_v13  ;;  %v1345_v12 = vld [vmem:[#allocation16 + $0x68] sm:$0xff]  ;;  %v1344_v1 = vld [vmem:[#allocation16 + $0x60] sm:$0xff]  ;;  %v1343_v13 = vld [vmem:[#allocation16 + $0x58] sm:$0xff] }
 0x3f9   :  { %v938_v14 = vpop.f32.mrf.mxu0 }
 0x3fa   :  { %v945_v16 = vmul.f32 %v938_v14, %v938_v14  ;;  %v1342_v14 = vld [vmem:[#allocation16 + $0x50] sm:$0xff] }
 0x3fb   :  { %v1813_v19 = vpop.f32.mrf.mxu0 }
 0x3fc   :  { %v946_v18 = vadd.f32 %v945_v16, %v944_v15  ;;  %v1341_v15 = vld [vmem:[#allocation16 + $0x48] sm:$0xff]  ;;  %v1340_v16 = vld [vmem:[#allocation16 + $0x40] sm:$0xff]  ;;  %v1339_v19 = vld [vmem:[#allocation16 + $0x38] sm:$0xff] }
 0x3fe   :  { %2053 = vrsqrt.f32 %v946_v18  ;;  %vm949_vm5 = vcmp.eq.f32.partialorder %v946_v18, inf  ;;  %v952_v22 = vand.u32 2147483648, %v946_v18  ;;  %vm951_vm6 = vcmp.eq.f32.partialorder %v946_v18, 0.0 }
 0x40b   :  { %v2054_v20 = vpop.eup %2053 }
 0x40c   :  { %v948_v21 = vmul.f32 %v2054_v20, %v946_v18  ;;  %v1337_v20 = vld [vmem:[#allocation16 + $0x28] sm:$0xff] }
 0x40e   :  { %v950_v23 = vsel %vm949_vm5, %v946_v18, %v948_v21  ;;  %v1338_v18 = vld [vmem:[#allocation16 + $0x30] sm:$0xff]  ;;  %v1336_v21 = vld [vmem:[#allocation16 + $0x20] sm:$0xff] }
 0x40f   :  { %v953_v24 = vsel %vm951_vm6, %v952_v22, %v950_v23  ;;  %v1335_v22 = vld [vmem:[#allocation16 + $0x18] sm:$0xff]  ;;  %v1544_v23 = vld [vmem:[%s2698_s12] ss:$0 sm:$0xff] }
 0x410   :  { %1847 = vmatmul.mubr.f32.vlgmr.msra.gmra.mxu1 %v953_v24 }
 0x411   :  { %1916 = vmatprep.mubr.msk.f32.mxu1 %vm2310_vm0, %v2309_v0  ;;  %1885 = vmatpush3.msra.mxu1 %v1160_v27  ;;  %v1334_v27 = vld [vmem:[#allocation16 + $0x10] sm:$0xff] }
 0x412   :  { %1886 = vmatprep.subr.mxu1 %v2309_v0 }
 0x413   :  { %1887 = vmatpush3.msra.mxu1 %v1159_v28  ;;  %v1333_v28 = vld [vmem:[#allocation16 + $0x8] sm:$0xff] }
 0x414   :  { %1888 = vmatprep.subr.mxu1 %v2309_v0 }
 0x415   :  { %1889 = vmatpush3.msra.mxu1 %v1158_v29  ;;  %v1332_v29 = vld [vmem:[#allocation16] sm:$0xff] }
 0x416   :  { %v2599_v25 = vpop.f32.mrf.mxu0  ;;  %1890 = vmatprep.subr.mxu1 %v2309_v0 }
 0x417   :  { %1891 = vmatpush3.msra.mxu1 %v1157_v30  ;;  %v1441_v30 = vld [vmem:[#allocation17 + $0x78] sm:$0xff] }
 0x418   :  { %v1883_v26 = vpop.f32.mrf.mxu0  ;;  %1892 = vmatprep.subr.mxu1 %v2309_v0 }
 0x419   :  { %1893 = vmatpush3.msra.mxu1 %v1156_v31  ;;  %v1440_v31 = vld [vmem:[#allocation17 + $0x70] sm:$0xff] }
 0x41a   :  { %1894 = vmatprep.subr.mxu1 %v2309_v0 }
 0x41b   :  { %1895 = vmatpush3.msra.mxu1 %v1155_v32  ;;  %v1439_v32 = vld [vmem:[#allocation17 + $0x68] sm:$0xff] }
 0x41c   :  { %1896 = vmatprep.subr.mxu1 %v2309_v0 }
 0x41d   :  { %1897 = vmatpush3.msra.mxu1 %v1154_v33  ;;  %v1438_v33 = vld [vmem:[#allocation17 + $0x60] sm:$0xff] }
 0x41e   :  { %1898 = vmatprep.subr.mxu1 %v2309_v0 }
 0x41f   :  { %1899 = vmatpush3.msra.mxu1 %v1153_v34  ;;  %v1437_v34 = vld [vmem:[#allocation17 + $0x58] sm:$0xff] }
 0x420   :  { %1900 = vmatprep.subr.mxu1 %v2309_v0 }
 0x421   :  { %1901 = vmatpush3.msra.mxu1 %v1152_v35  ;;  %v1436_v35 = vld [vmem:[#allocation17 + $0x50] sm:$0xff] }
 0x422   :  { %1902 = vmatprep.subr.mxu1 %v2309_v0 }
 0x423   :  { %1903 = vmatpush3.msra.mxu1 %v1151_v36  ;;  %v1435_v36 = vld [vmem:[#allocation17 + $0x48] sm:$0xff] }
 0x424   :  { %1904 = vmatprep.subr.mxu1 %v2309_v0 }
 0x425   :  { %1905 = vmatpush3.msra.mxu1 %v1150_v17  ;;  %v1434_v17 = vld [vmem:[#allocation17 + $0x40] sm:$0xff] }
 0x426   :  { %1906 = vmatprep.subr.mxu1 %v2309_v0 }
 0x427   :  { %1907 = vmatpush3.msra.mxu1 %v1149_v37  ;;  %v1433_v37 = vld [vmem:[#allocation17 + $0x38] sm:$0xff] }
 0x428   :  { %1908 = vmatprep.subr.mxu1 %v2309_v0 }
 0x429   :  { %1909 = vmatpush3.msra.mxu1 %v1148_v38  ;;  %v1432_v38 = vld [vmem:[#allocation17 + $0x30] sm:$0xff] }
 0x42a   :  { %1910 = vmatprep.subr.mxu1 %v2309_v0 }
 0x42b   :  { %1911 = vmatpush3.msra.mxu1 %v1147_v39  ;;  %v1431_v39 = vld [vmem:[#allocation17 + $0x28] sm:$0xff] }
 0x42c   :  { %1912 = vmatprep.subr.mxu1 %v2309_v0 }
 0x42d   :  { %1913 = vmatpush3.msra.mxu1 %v1146_v40  ;;  %v1430_v40 = vld [vmem:[#allocation17 + $0x20] sm:$0xff] }
 0x42e   :  { %1914 = vmatprep.subr.mxu1 %v2309_v0 }
 0x42f   :  { %1915 = vmatpush3.msra.mxu1 %v1145_v41  ;;  %v1429_v41 = vld [vmem:[#allocation17 + $0x18] sm:$0xff] }
 0x430   :  { %1954 = vmatprep.subr.mxu1 %v2309_v0 }
 0x4d0   :  { %v1052_v56 = vpop.f32.mrf.mxu1 }
 0x4d1   :  { %v1123_v58 = vadd.f32 %v2599_v25, %v1052_v56 }
 0x4d2   :  { %v1848_v59 = vpop.f32.mrf.mxu1 }
 0x4d3   :  { %v1133_v60 = vadd.f32 %v1543_v57, %v1123_v58 }
 0x4d5   :  { %v1134_v61 = vand.u32 2147483647, %v1133_v60  ;;  %vm1141_vm7 = vcmp.ge.f32.partialorder %v1133_v60, 0.0 }
 0x4d7   :  { %v1135_v62 = vsub.f32 0.0, %v1134_v61 }
 0x4d9   :  { %v1136_v63 = vmul.f32 1.442695, %v1135_v62 }
 0x4db   :  { %2055 = vpow2.f32 %v1136_v63 }
 0x4e8   :  { %v2056_v2 = vpop.eup %2055 }
 0x4e9   :  { %v1138_v3 = vadd.f32 1.0, %v2056_v2 }
 0x4eb   :  { %2057 = vrcp.f32 %v1138_v3 }
 0x4f8   :  { %v2058_v4 = vpop.eup %2057 }
 0x4f9   :  { %v1142_v5 = vsub.f32 1.0, %v2058_v4 }
 0x4fb   :  { %v1143_v6 = vsel %vm1141_vm7, %v2058_v4, %v1142_v5 }
 0x4fc   :  { %v1144_v7 = vmul.f32 %v1143_v6, %v1133_v60 }
 0x4fe   :  { %1917 = vmatmul.mubr.f32.vlgmr.msra.gmra.mxu1 %v1144_v7 }
 0x4ff   :  { %1986 = vmatprep.mubr.msk.f32.mxu1 %vm2310_vm0, %v2309_v0  ;;  %1955 = vmatpush3.msra.mxu1 %v1347_v10 }
 0x500   :  { %1956 = vmatprep.subr.mxu1 %v2309_v0 }
 0x501   :  { %1957 = vmatpush3.msra.mxu1 %v1346_v11 }
 0x502   :  { %1958 = vmatprep.subr.mxu1 %v2309_v0 }
 0x503   :  { %1959 = vmatpush3.msra.mxu1 %v1345_v12 }
 0x504   :  { %1960 = vmatprep.subr.mxu1 %v2309_v0 }
 0x505   :  { %1961 = vmatpush3.msra.mxu1 %v1344_v1 }
 0x506   :  { %1962 = vmatprep.subr.mxu1 %v2309_v0 }
 0x507   :  { %1963 = vmatpush3.msra.mxu1 %v1343_v13 }
 0x508   :  { %1964 = vmatprep.subr.mxu1 %v2309_v0 }
 0x509   :  { %1965 = vmatpush3.msra.mxu1 %v1342_v14 }
 0x50a   :  { %1966 = vmatprep.subr.mxu1 %v2309_v0 }
 0x50b   :  { %1967 = vmatpush3.msra.mxu1 %v1341_v15 }
 0x50c   :  { %1968 = vmatprep.subr.mxu1 %v2309_v0 }
 0x50d   :  { %1969 = vmatpush3.msra.mxu1 %v1340_v16 }
 0x50e   :  { %1970 = vmatprep.subr.mxu1 %v2309_v0 }
 0x50f   :  { %1971 = vmatpush3.msra.mxu1 %v1339_v19 }
 0x510   :  { %1972 = vmatprep.subr.mxu1 %v2309_v0 }
 0x511   :  { %1973 = vmatpush3.msra.mxu1 %v1338_v18 }
 0x512   :  { %1974 = vmatprep.subr.mxu1 %v2309_v0 }
 0x513   :  { %1975 = vmatpush3.msra.mxu1 %v1337_v20 }
 0x514   :  { %1976 = vmatprep.subr.mxu1 %v2309_v0 }
 0x515   :  { %1977 = vmatpush3.msra.mxu1 %v1336_v21 }
 0x516   :  { %1978 = vmatprep.subr.mxu1 %v2309_v0 }
 0x517   :  { %1979 = vmatpush3.msra.mxu1 %v1335_v22 }
 0x518   :  { %1980 = vmatprep.subr.mxu1 %v2309_v0 }
 0x519   :  { %1981 = vmatpush3.msra.mxu1 %v1334_v27 }
 0x51a   :  { %1982 = vmatprep.subr.mxu1 %v2309_v0 }
 0x51b   :  { %1983 = vmatpush3.msra.mxu1 %v1333_v28 }
 0x51c   :  { %1984 = vmatprep.subr.mxu1 %v2309_v0 }
 0x51d   :  { %1985 = vmatpush3.msra.mxu1 %v1332_v29 }
 0x5be   :  { %v1234_v24 = vpop.f32.mrf.mxu1 }
 0x5bf   :  { %v1235_v25 = vadd.f32 %v1544_v23, %v1234_v24 }
 0x5c0   :  { %v1918_v26 = vpop.f32.mrf.mxu1 }
 0x5c1   :  { %1952 = vmatmul.mubr.f32.vlgmr.msra.gmra.mxu0 %v1235_v25 }
 0x5c2   :  { %2021 = vmatprep.mubr.msk.f32.mxu0 %vm2310_vm0, %v2309_v0  ;;  %1990 = vmatpush3.msra.mxu0 %v1441_v30 }
 0x5c3   :  { %1991 = vmatprep.subr.mxu0 %v2309_v0 }
 0x5c4   :  { %1992 = vmatpush3.msra.mxu0 %v1440_v31 }
 0x5c5   :  { %1993 = vmatprep.subr.mxu0 %v2309_v0 }
 0x5c6   :  { %1994 = vmatpush3.msra.mxu0 %v1439_v32 }
 0x5c7   :  { %1995 = vmatprep.subr.mxu0 %v2309_v0 }
 0x5c8   :  { %1996 = vmatpush3.msra.mxu0 %v1438_v33 }
 0x5c9   :  { %1997 = vmatprep.subr.mxu0 %v2309_v0 }
 0x5ca   :  { %1998 = vmatpush3.msra.mxu0 %v1437_v34 }
 0x5cb   :  { %1999 = vmatprep.subr.mxu0 %v2309_v0 }
 0x5cc   :  { %2000 = vmatpush3.msra.mxu0 %v1436_v35 }
 0x5cd   :  { %2001 = vmatprep.subr.mxu0 %v2309_v0 }
 0x5ce   :  { %2002 = vmatpush3.msra.mxu0 %v1435_v36 }
 0x5cf   :  { %2003 = vmatprep.subr.mxu0 %v2309_v0 }
 0x5d0   :  { %2004 = vmatpush3.msra.mxu0 %v1434_v17 }
 0x5d1   :  { %2005 = vmatprep.subr.mxu0 %v2309_v0 }
 0x5d2   :  { %2006 = vmatpush3.msra.mxu0 %v1433_v37 }
 0x5d3   :  { %2007 = vmatprep.subr.mxu0 %v2309_v0 }
 0x5d4   :  { %2008 = vmatpush3.msra.mxu0 %v1432_v38 }
 0x5d5   :  { %2009 = vmatprep.subr.mxu0 %v2309_v0 }
 0x5d6   :  { %2010 = vmatpush3.msra.mxu0 %v1431_v39 }
 0x5d7   :  { %2011 = vmatprep.subr.mxu0 %v2309_v0 }
 0x5d8   :  { %2012 = vmatpush3.msra.mxu0 %v1430_v40 }
 0x5d9   :  { %2013 = vmatprep.subr.mxu0 %v2309_v0 }
 0x5da   :  { %2014 = vmatpush3.msra.mxu0 %v1429_v41 }
 0x5db   :  { %2015 = vmatprep.subr.mxu0 %v2309_v0 }
 0x5dc   :  { %2016 = vmatpush3.msra.mxu0 %v1428_v47 }
 0x5dd   :  { %2017 = vmatprep.subr.mxu0 %v2309_v0 }
 0x5de   :  { %2018 = vmatpush3.msra.mxu0 %v1427_v48 }
 0x5df   :  { %2019 = vmatprep.subr.mxu0 %v2309_v0 }
 0x5e0   :  { %2020 = vmatpush3.msra.mxu0 %v1426_v49 }
 0x681   :  { %v1327_v43 = vpop.f32.mrf.mxu0 }
 0x682   :  { %v1328_v44 = vadd.f32 %v1545_v42, %v1327_v43 }
 0x683   :  { %v1953_v45 = vpop.f32.mrf.mxu0 }
 0x684   :  { %v1331_v46 = vmax.f32 %v1328_v44, 0.0 }
 0x686   :  { %1987 = vmatmul.mubr.f32.vlgmr.msra.gmra.mxu1 %v1331_v46 }
 0x746   :  { %v1421_v51 = vpop.f32.mrf.mxu1 }
 0x747   :  { %v1422_v52 = vadd.f32 %v1546_v50, %v1421_v51 }
 0x748   :  { %v1988_v53 = vpop.f32.mrf.mxu1 }
 0x749   :  { %v1425_v54 = vmax.f32 %v1422_v52, 0.0 }
 0x74b   :  { %2022 = vmatmul.mubr.f32.vlgmr.msra.gmra.mxu0 %v1425_v54 }
 0x80b   :  { %v1515_v56 = vpop.f32.mrf.mxu0 }
 0x80c   :  { %v1516_v57 = vadd.f32 %v1547_v55, %v1515_v56 }
 0x80d   :  { %v2023_v0 = vpop.f32.mrf.mxu0 }
 0x80e   :  { %1519 = vst [vmem:[#allocation19] sm:$0xff] %v1516_v57 }
 0x80f   :  { %2270 = shalt.err (!%p2267_p12)
}
 0x810   :  { %1529 = dma.vmem_to_hbm [thread:$0]  %s1527_s13, 128, %s2705_s19, [#allocation4]  }
 0x811   :  { %2291 = dma.done.wait [#allocation4], 128  }
 0x812   :  { %2292 = vsyncadd [#allocation4], 4294967168 }
 0x813   :  { %1533 = vsyncpa [#allocation3], 1 }
 0x814   :  { %1534 = vsyncpa [#allocation6], 1 }
 0x815   :  { %1535 = vsyncpa [#allocation9], 1 }
 0x816   :  { %1536 = vsyncpa [#allocation12], 1 }
 0x817   :  { %1537 = vsyncpa [#allocation15], 1 }
 0x818   :  { %1538 = vsyncpa [#allocation18], 1 }
 0x819   :  { %1539 = vsyncpa [#allocation4], 1 }

</bundles_post_ra>
